<compile_context>
chip_gen: v7x
topology: tpu7x:2x2x1
jax: 0.10.0
libtpu: 0.0.40
codegen_flags: <defaults>
</compile_context>

<pallas_src>
import functools

import jax
import jax.numpy as jnp
import numpy as np
from jax.experimental import pallas as pl
from jax.experimental.pallas import tpu as pltpu


def _kld_kernel(attn_ref, cid_ref,
                cnt_out, sat_out, l_out, m_out,
                cnt_acc, sat_acc, l_acc, m_acc, *, num_clusters):
    neg = jnp.float32(-1e30)
    j = pl.program_id(1)

    @pl.when(j == 0)
    def _init():
        cnt_acc[...] = jnp.zeros_like(cnt_acc)
        sat_acc[...] = jnp.zeros_like(sat_acc)
        l_acc[...] = jnp.zeros_like(l_acc)
        m_acc[...] = jnp.full_like(m_acc, neg)

    attn = attn_ref[...]                              # (tr, 128) f32
    cid = cid_ref[...]                                # (tr, 128) i32

    # Flash-style per-lane running max; exp is evaluated ONCE per element.
    m_old = m_acc[...]                                # (1, 128)
    blk_max = jnp.max(attn, axis=0, keepdims=True)    # (1, 128)  row reduce only
    m_new = jnp.maximum(m_old, blk_max)
    alpha = jnp.exp(m_old - m_new)                    # finite: sentinel is -1e30
    p = jnp.exp(attn - m_new)                         # (tr, 128), one exp/element
    m_acc[...] = m_new
    l_acc[...] = l_acc[...] * alpha                   # rescale all clusters at once

    # Stream clusters one at a time: one (tr,128) mask live at a time, three
    # multiply-accumulates into lane-resident (C,128) accumulators.  Only
    # row-axis reductions here; cross-lane reductions are deferred to finalize.
    for c in range(num_clusters):
        row = pl.ds(c, 1)
        mask = (cid == c).astype(jnp.float32)         # (tr, 128)
        cnt_acc[row, :] = cnt_acc[row, :] + jnp.sum(mask, axis=0, keepdims=True)
        sat_acc[row, :] = sat_acc[row, :] + jnp.sum(mask * attn, axis=0,
                                                    keepdims=True)
        l_acc[row, :] = l_acc[row, :] + jnp.sum(mask * p, axis=0, keepdims=True)

    @pl.when(j == pl.num_programs(1) - 1)
    def _flush():
        cnt_out[...] = cnt_acc[...]
        sat_out[...] = sat_acc[...]
        l_out[...] = l_acc[...]
        m_out[...] = m_acc[...]


def kld_loss(attn_val, cluster, num_clusters=8, block_rows=512):
    """Pallas implementation of KLDLoss.forward.

    attn_val: (1, N) or (N,) float attention values.
    cluster:  (N,) integer cluster ids in [0, num_clusters).
    """
    attn = jnp.asarray(attn_val, jnp.float32).reshape(-1)
    cid = jnp.asarray(cluster, jnp.int32).reshape(-1)
    n = attn.shape[0]
    assert cid.shape[0] == n

    LANES = 128
    NC = 2                      # parallel slices: both v7x TCs; harmless on 1-TC
    C = num_clusters

    rows_min = max(1, pl.cdiv(n, LANES))
    tr = min(int(block_rows), ((pl.cdiv(rows_min, NC) + 7) // 8) * 8)
    tr = max(8, (tr // 8) * 8)
    J = pl.cdiv(rows_min, NC * tr)                    # row blocks per slice
    rows = NC * J * tr
    npad = rows * LANES

    attn_p = jnp.pad(attn, (0, npad - n)).reshape(rows, LANES)
    cid_p = jnp.pad(cid, (0, npad - n), constant_values=-1).reshape(rows, LANES)

    kernel = functools.partial(_kld_kernel, num_clusters=C)
    out_shapes = (
        jax.ShapeDtypeStruct((NC, C, LANES), jnp.float32),   # counts
        jax.ShapeDtypeStruct((NC, C, LANES), jnp.float32),   # sum(attn)
        jax.ShapeDtypeStruct((NC, C, LANES), jnp.float32),   # sum(exp(attn-m))
        jax.ShapeDtypeStruct((NC, 1, LANES), jnp.float32),   # per-lane running max
    )
    cnt, sat, l, m = pl.pallas_call(
        kernel,
        out_shape=out_shapes,
        grid=(NC, J),
        in_specs=[
            pl.BlockSpec((tr, LANES), lambda p, j: (p * J + j, 0)),
            pl.BlockSpec((tr, LANES), lambda p, j: (p * J + j, 0)),
        ],
        out_specs=(
            pl.BlockSpec((None, C, LANES), lambda p, j: (p, 0, 0)),
            pl.BlockSpec((None, C, LANES), lambda p, j: (p, 0, 0)),
            pl.BlockSpec((None, C, LANES), lambda p, j: (p, 0, 0)),
            pl.BlockSpec((None, 1, LANES), lambda p, j: (p, 0, 0)),
        ),
        scratch_shapes=[
            pltpu.VMEM((C, LANES), jnp.float32),
            pltpu.VMEM((C, LANES), jnp.float32),
            pltpu.VMEM((C, LANES), jnp.float32),
            pltpu.VMEM((1, LANES), jnp.float32),
        ],
        compiler_params=pltpu.CompilerParams(
            dimension_semantics=("parallel", "arbitrary")),
    )(attn_p, cid_p)

    # Tiny finalize in plain JAX (2*C*128 floats): flash-combine the per-slice,
    # per-lane partials, then the per-cluster KLD.
    M = jnp.max(m)                                    # scalar, always finite
    w = jnp.exp(m - M)                                # (NC, 1, 128)
    l_tot = jnp.sum(l * w, axis=(0, 2))               # (C,)
    cnt_tot = jnp.sum(cnt, axis=(0, 2))               # (C,)
    sat_tot = jnp.sum(sat, axis=(0, 2))               # (C,)

    use = cnt_tot > 4.5                               # skip clusters with <= 4 members
    safe_cnt = jnp.maximum(cnt_tot, 1.0)
    safe_l = jnp.maximum(l_tot, jnp.float32(1e-30))
    lse = M + jnp.log(safe_l)                         # per-cluster logsumexp
    # sum_{i in c} log_softmax_i = sum_attn_c - count_c * logsumexp_c
    sum_logsm = sat_tot - cnt_tot * lse
    kld = -jnp.log(safe_cnt) - sum_logsm / safe_cnt
    return jnp.sum(jnp.where(use, kld, jnp.float32(0.0)))


def kld_loss_ref(attn_val, cluster):
    """Pure numpy reference, line-by-line faithful to the PyTorch module code."""
    attn = np.asarray(attn_val, np.float64).reshape(-1)
    clus = np.asarray(cluster)
    total = 0.0
    for c in np.unique(clus):
        idx = np.where(clus == c)[0]
        if len(idx) <= 4:
            continue
        x = attn[idx]
        m = x.max()
        logp = x - m - np.log(np.sum(np.exp(x - m)))      # log_softmax
        k = len(idx)
        # F.kl_div(logp, uniform, reduction='batchmean'), batch = 1
        total += -np.log(k) - logp.sum() / k
    return total


if __name__ == "__main__":
    key = jax.random.PRNGKey(0)
    k1, k2, k3 = jax.random.split(key, 3)

    # Test 1: the module's docstring example (we match the code/reference,
    # ~6.16e-4, not the stale 0.0043 docstring constant).
    attn2 = jnp.array([[0.05, 0.1, 0.05, 0.1, 0.05, 0.1, 0.05,
                        0.05, 0.1, 0.05, 0.1, 0.05, 0.1, 0.05]], jnp.float32)
    clus2 = jnp.array([1, 1, 1, 1, 1, 1, 1, 2, 2, 2, 2, 2, 2, 2], jnp.int32)
    out2 = jax.block_until_ready(kld_loss(attn2, clus2))
    ref2 = kld_loss_ref(np.asarray(attn2), np.asarray(clus2))
    assert abs(float(out2) - float(ref2)) < 1e-5, (float(out2), float(ref2))

    # Test 2: random clusters, small block_rows to exercise the multi-block
    # streaming accumulation (grid (2, 4)) and the 2-slice combine path.
    N = 8192
    attn1 = jax.random.normal(k1, (1, N), dtype=jnp.float32) * 0.5
    clus1 = jax.random.randint(k2, (N,), 0, 8, dtype=jnp.int32)
    out1 = jax.block_until_ready(
        kld_loss(attn1, clus1, num_clusters=8, block_rows=8))
    ref1 = kld_loss_ref(np.asarray(attn1), np.asarray(clus1))
    np.testing.assert_allclose(float(out1), float(ref1), rtol=5e-4, atol=1e-5)

    # Test 3: includes a cluster with <= 4 members (must be skipped) and
    # absent cluster ids; default (large) block_rows with heavy padding.
    N3 = 20
    attn3 = jax.random.uniform(k3, (1, N3), dtype=jnp.float32)
    clus3 = jnp.array([0] * 9 + [3] * 8 + [5] * 3, dtype=jnp.int32)
    out3 = jax.block_until_ready(kld_loss(attn3, clus3))
    ref3 = kld_loss_ref(np.asarray(attn3), np.asarray(clus3))
    assert abs(float(out3) - float(ref3)) < 2e-5, (float(out3), float(ref3))

    print("KERNEL_OK")
</pallas_src>

<mosaic_0001>
module attributes {stable_mosaic.version = 11 : i64} {
  func.func @_kld_kernel(%arg0: i32, %arg1: i32, %arg2: memref<8x128xf32, #tpu.memory_space<vmem>>, %arg3: memref<8x128xi32, #tpu.memory_space<vmem>>, %arg4: memref<1x8x128xf32, #tpu.memory_space<vmem>>, %arg5: memref<1x8x128xf32, #tpu.memory_space<vmem>>, %arg6: memref<1x8x128xf32, #tpu.memory_space<vmem>>, %arg7: memref<1x1x128xf32, #tpu.memory_space<vmem>>, %arg8: memref<8x128xf32, #tpu.memory_space<vmem>>, %arg9: memref<8x128xf32, #tpu.memory_space<vmem>>, %arg10: memref<8x128xf32, #tpu.memory_space<vmem>>, %arg11: memref<1x128xf32, #tpu.memory_space<vmem>>) attributes {dimension_semantics = [#tpu.dimension_semantics<parallel>, #tpu.dimension_semantics<arbitrary>], iteration_bounds = array<i64: 2, 1>, scalar_prefetch = 0 : i64, scratch_operands = 4 : i64, tpu.core_type = #tpu.core_type<tc>, window_params = [{transform_indices = @transform_0, window_bounds = array<i64: 8, 128>}, {transform_indices = @transform_1, window_bounds = array<i64: 8, 128>}, {transform_indices = @transform_2, window_bounds = array<i64: 1, 8, 128>}, {transform_indices = @transform_3, window_bounds = array<i64: 1, 8, 128>}, {transform_indices = @transform_4, window_bounds = array<i64: 1, 8, 128>}, {transform_indices = @transform_5, window_bounds = array<i64: 1, 1, 128>}]} {
    %c0_i32 = arith.constant 0 : i32
    %0 = arith.cmpi eq, %arg1, %c0_i32 : i32
    %1 = arith.extui %0 : i1 to i32
    %cst = arith.constant -1.000000e+30 : f32
    %c0_i32_0 = arith.constant 0 : i32
    %2 = arith.cmpi ne, %1, %c0_i32_0 : i32
    scf.if %2 {
      %cst_129 = arith.constant 0.000000e+00 : f32
      %190 = vector.broadcast %cst_129 : f32 to vector<8x128xf32>
      %c0_130 = arith.constant 0 : index
      %c0_131 = arith.constant 0 : index
      %191 = vector.load %arg8[%c0_130, %c0_131] : memref<8x128xf32, #tpu.memory_space<vmem>>, vector<8x128xf32>
      tpu.vector_store %arg8[%c0_130, %c0_131], %190 {strides = array<i32>} : memref<8x128xf32, #tpu.memory_space<vmem>>, vector<8x128xf32>,
      %cst_132 = arith.constant 0.000000e+00 : f32
      %192 = vector.broadcast %cst_132 : f32 to vector<8x128xf32>
      %c0_133 = arith.constant 0 : index
      %c0_134 = arith.constant 0 : index
      %193 = vector.load %arg9[%c0_133, %c0_134] : memref<8x128xf32, #tpu.memory_space<vmem>>, vector<8x128xf32>
      tpu.vector_store %arg9[%c0_133, %c0_134], %192 {strides = array<i32>} : memref<8x128xf32, #tpu.memory_space<vmem>>, vector<8x128xf32>,
      %cst_135 = arith.constant 0.000000e+00 : f32
      %194 = vector.broadcast %cst_135 : f32 to vector<8x128xf32>
      %c0_136 = arith.constant 0 : index
      %c0_137 = arith.constant 0 : index
      %195 = vector.load %arg10[%c0_136, %c0_137] : memref<8x128xf32, #tpu.memory_space<vmem>>, vector<8x128xf32>
      tpu.vector_store %arg10[%c0_136, %c0_137], %194 {strides = array<i32>} : memref<8x128xf32, #tpu.memory_space<vmem>>, vector<8x128xf32>,
      %196 = vector.broadcast %cst : f32 to vector<1x128xf32>
      %c0_138 = arith.constant 0 : index
      %c0_139 = arith.constant 0 : index
      %197 = vector.load %arg11[%c0_138, %c0_139] : memref<1x128xf32, #tpu.memory_space<vmem>>, vector<1x128xf32>
      tpu.vector_store %arg11[%c0_138, %c0_139], %196 {strides = array<i32>} : memref<1x128xf32, #tpu.memory_space<vmem>>, vector<1x128xf32>,
    } else {
    }
    %c0 = arith.constant 0 : index
    %c0_1 = arith.constant 0 : index
    %3 = vector.load %arg2[%c0, %c0_1] : memref<8x128xf32, #tpu.memory_space<vmem>>, vector<8x128xf32>
    %c0_2 = arith.constant 0 : index
    %c0_3 = arith.constant 0 : index
    %4 = vector.load %arg3[%c0_2, %c0_3] : memref<8x128xi32, #tpu.memory_space<vmem>>, vector<8x128xi32>
    %c0_4 = arith.constant 0 : index
    %c0_5 = arith.constant 0 : index
    %5 = vector.load %arg11[%c0_4, %c0_5] : memref<1x128xf32, #tpu.memory_space<vmem>>, vector<1x128xf32>
    %cst_6 = arith.constant dense<0xFF800000> : vector<128xf32>
    %6 = vector.multi_reduction <maximumf>, %3, %cst_6 [0] : vector<8x128xf32> to vector<128xf32>
    %7 = vector.shape_cast %6 : vector<128xf32> to vector<1x128xf32>
    %8 = arith.maximumf %5, %7 : vector<1x128xf32>
    %9 = arith.subf %5, %8 : vector<1x128xf32>
    %10 = math.exp %9 : vector<1x128xf32>
    %11 = vector.broadcast %8 : vector<1x128xf32> to vector<8x128xf32>
    %12 = arith.subf %3, %11 : vector<8x128xf32>
    %13 = math.exp %12 : vector<8x128xf32>
    %c0_7 = arith.constant 0 : index
    %c0_8 = arith.constant 0 : index
    %14 = vector.load %arg11[%c0_7, %c0_8] : memref<1x128xf32, #tpu.memory_space<vmem>>, vector<1x128xf32>
    tpu.vector_store %arg11[%c0_7, %c0_8], %8 {strides = array<i32>} : memref<1x128xf32, #tpu.memory_space<vmem>>, vector<1x128xf32>,
    %c0_9 = arith.constant 0 : index
    %c0_10 = arith.constant 0 : index
    %15 = vector.load %arg10[%c0_9, %c0_10] : memref<8x128xf32, #tpu.memory_space<vmem>>, vector<8x128xf32>
    %16 = vector.broadcast %10 : vector<1x128xf32> to vector<8x128xf32>
    %17 = arith.mulf %15, %16 : vector<8x128xf32>
    %c0_11 = arith.constant 0 : index
    %c0_12 = arith.constant 0 : index
    %18 = vector.load %arg10[%c0_11, %c0_12] : memref<8x128xf32, #tpu.memory_space<vmem>>, vector<8x128xf32>
    tpu.vector_store %arg10[%c0_11, %c0_12], %17 {strides = array<i32>} : memref<8x128xf32, #tpu.memory_space<vmem>>, vector<8x128xf32>,
    %c0_i32_13 = arith.constant 0 : i32
    %19 = vector.broadcast %c0_i32_13 : i32 to vector<8x128xi32>
    %20 = arith.cmpi eq, %4, %19 : vector<8x128xi32>
    %21 = arith.extui %20 : vector<8x128xi1> to vector<8x128xi32>
    %22 = arith.sitofp %21 : vector<8x128xi32> to vector<8x128xf32>
    %c0_14 = arith.constant 0 : index
    %c0_15 = arith.constant 0 : index
    %23 = vector.load %arg8[%c0_14, %c0_15] : memref<8x128xf32, #tpu.memory_space<vmem>>, vector<1x128xf32>
    %cst_16 = arith.constant dense<0.000000e+00> : vector<128xf32>
    %24 = vector.multi_reduction <add>, %22, %cst_16 [0] : vector<8x128xf32> to vector<128xf32>
    %25 = vector.shape_cast %24 : vector<128xf32> to vector<1x128xf32>
    %26 = arith.addf %23, %25 : vector<1x128xf32>
    %c0_17 = arith.constant 0 : index
    %c0_18 = arith.constant 0 : index
    %27 = vector.load %arg8[%c0_17, %c0_18] : memref<8x128xf32, #tpu.memory_space<vmem>>, vector<1x128xf32>
    tpu.vector_store %arg8[%c0_17, %c0_18], %26 {strides = array<i32>} : memref<8x128xf32, #tpu.memory_space<vmem>>, vector<1x128xf32>,
    %c0_19 = arith.constant 0 : index
    %c0_20 = arith.constant 0 : index
    %28 = vector.load %arg9[%c0_19, %c0_20] : memref<8x128xf32, #tpu.memory_space<vmem>>, vector<1x128xf32>
    %29 = arith.mulf %22, %3 : vector<8x128xf32>
    %cst_21 = arith.constant dense<0.000000e+00> : vector<128xf32>
    %30 = vector.multi_reduction <add>, %29, %cst_21 [0] : vector<8x128xf32> to vector<128xf32>
    %31 = vector.shape_cast %30 : vector<128xf32> to vector<1x128xf32>
    %32 = arith.addf %28, %31 : vector<1x128xf32>
    %c0_22 = arith.constant 0 : index
    %c0_23 = arith.constant 0 : index
    %33 = vector.load %arg9[%c0_22, %c0_23] : memref<8x128xf32, #tpu.memory_space<vmem>>, vector<1x128xf32>
    tpu.vector_store %arg9[%c0_22, %c0_23], %32 {strides = array<i32>} : memref<8x128xf32, #tpu.memory_space<vmem>>, vector<1x128xf32>,
    %c0_24 = arith.constant 0 : index
    %c0_25 = arith.constant 0 : index
    %34 = vector.load %arg10[%c0_24, %c0_25] : memref<8x128xf32, #tpu.memory_space<vmem>>, vector<1x128xf32>
    %35 = arith.mulf %22, %13 : vector<8x128xf32>
    %cst_26 = arith.constant dense<0.000000e+00> : vector<128xf32>
    %36 = vector.multi_reduction <add>, %35, %cst_26 [0] : vector<8x128xf32> to vector<128xf32>
    %37 = vector.shape_cast %36 : vector<128xf32> to vector<1x128xf32>
    %38 = arith.addf %34, %37 : vector<1x128xf32>
    %c0_27 = arith.constant 0 : index
    %c0_28 = arith.constant 0 : index
    %39 = vector.load %arg10[%c0_27, %c0_28] : memref<8x128xf32, #tpu.memory_space<vmem>>, vector<1x128xf32>
    tpu.vector_store %arg10[%c0_27, %c0_28], %38 {strides = array<i32>} : memref<8x128xf32, #tpu.memory_space<vmem>>, vector<1x128xf32>,
    %c1_i32 = arith.constant 1 : i32
    %40 = vector.broadcast %c1_i32 : i32 to vector<8x128xi32>
    %41 = arith.cmpi eq, %4, %40 : vector<8x128xi32>
    %42 = arith.extui %41 : vector<8x128xi1> to vector<8x128xi32>
    %43 = arith.sitofp %42 : vector<8x128xi32> to vector<8x128xf32>
    %c1 = arith.constant 1 : index
    %c0_29 = arith.constant 0 : index
    %44 = vector.load %arg8[%c1, %c0_29] : memref<8x128xf32, #tpu.memory_space<vmem>>, vector<1x128xf32>
    %cst_30 = arith.constant dense<0.000000e+00> : vector<128xf32>
    %45 = vector.multi_reduction <add>, %43, %cst_30 [0] : vector<8x128xf32> to vector<128xf32>
    %46 = vector.shape_cast %45 : vector<128xf32> to vector<1x128xf32>
    %47 = arith.addf %44, %46 : vector<1x128xf32>
    %c1_31 = arith.constant 1 : index
    %c0_32 = arith.constant 0 : index
    %48 = vector.load %arg8[%c1_31, %c0_32] : memref<8x128xf32, #tpu.memory_space<vmem>>, vector<1x128xf32>
    tpu.vector_store %arg8[%c1_31, %c0_32], %47 {strides = array<i32>} : memref<8x128xf32, #tpu.memory_space<vmem>>, vector<1x128xf32>,
    %c1_33 = arith.constant 1 : index
    %c0_34 = arith.constant 0 : index
    %49 = vector.load %arg9[%c1_33, %c0_34] : memref<8x128xf32, #tpu.memory_space<vmem>>, vector<1x128xf32>
    %50 = arith.mulf %43, %3 : vector<8x128xf32>
    %cst_35 = arith.constant dense<0.000000e+00> : vector<128xf32>
    %51 = vector.multi_reduction <add>, %50, %cst_35 [0] : vector<8x128xf32> to vector<128xf32>
    %52 = vector.shape_cast %51 : vector<128xf32> to vector<1x128xf32>
    %53 = arith.addf %49, %52 : vector<1x128xf32>
    %c1_36 = arith.constant 1 : index
    %c0_37 = arith.constant 0 : index
    %54 = vector.load %arg9[%c1_36, %c0_37] : memref<8x128xf32, #tpu.memory_space<vmem>>, vector<1x128xf32>
    tpu.vector_store %arg9[%c1_36, %c0_37], %53 {strides = array<i32>} : memref<8x128xf32, #tpu.memory_space<vmem>>, vector<1x128xf32>,
    %c1_38 = arith.constant 1 : index
    %c0_39 = arith.constant 0 : index
    %55 = vector.load %arg10[%c1_38, %c0_39] : memref<8x128xf32, #tpu.memory_space<vmem>>, vector<1x128xf32>
    %56 = arith.mulf %43, %13 : vector<8x128xf32>
    %cst_40 = arith.constant dense<0.000000e+00> : vector<128xf32>
    %57 = vector.multi_reduction <add>, %56, %cst_40 [0] : vector<8x128xf32> to vector<128xf32>
    %58 = vector.shape_cast %57 : vector<128xf32> to vector<1x128xf32>
    %59 = arith.addf %55, %58 : vector<1x128xf32>
    %c1_41 = arith.constant 1 : index
    %c0_42 = arith.constant 0 : index
    %60 = vector.load %arg10[%c1_41, %c0_42] : memref<8x128xf32, #tpu.memory_space<vmem>>, vector<1x128xf32>
    tpu.vector_store %arg10[%c1_41, %c0_42], %59 {strides = array<i32>} : memref<8x128xf32, #tpu.memory_space<vmem>>, vector<1x128xf32>,
    %c2_i32 = arith.constant 2 : i32
    %61 = vector.broadcast %c2_i32 : i32 to vector<8x128xi32>
    %62 = arith.cmpi eq, %4, %61 : vector<8x128xi32>
    %63 = arith.extui %62 : vector<8x128xi1> to vector<8x128xi32>
    %64 = arith.sitofp %63 : vector<8x128xi32> to vector<8x128xf32>
    %c2 = arith.constant 2 : index
    %c0_43 = arith.constant 0 : index
    %65 = vector.load %arg8[%c2, %c0_43] : memref<8x128xf32, #tpu.memory_space<vmem>>, vector<1x128xf32>
    %cst_44 = arith.constant dense<0.000000e+00> : vector<128xf32>
    %66 = vector.multi_reduction <add>, %64, %cst_44 [0] : vector<8x128xf32> to vector<128xf32>
    %67 = vector.shape_cast %66 : vector<128xf32> to vector<1x128xf32>
    %68 = arith.addf %65, %67 : vector<1x128xf32>
    %c2_45 = arith.constant 2 : index
    %c0_46 = arith.constant 0 : index
    %69 = vector.load %arg8[%c2_45, %c0_46] : memref<8x128xf32, #tpu.memory_space<vmem>>, vector<1x128xf32>
    tpu.vector_store %arg8[%c2_45, %c0_46], %68 {strides = array<i32>} : memref<8x128xf32, #tpu.memory_space<vmem>>, vector<1x128xf32>,
    %c2_47 = arith.constant 2 : index
    %c0_48 = arith.constant 0 : index
    %70 = vector.load %arg9[%c2_47, %c0_48] : memref<8x128xf32, #tpu.memory_space<vmem>>, vector<1x128xf32>
    %71 = arith.mulf %64, %3 : vector<8x128xf32>
    %cst_49 = arith.constant dense<0.000000e+00> : vector<128xf32>
    %72 = vector.multi_reduction <add>, %71, %cst_49 [0] : vector<8x128xf32> to vector<128xf32>
    %73 = vector.shape_cast %72 : vector<128xf32> to vector<1x128xf32>
    %74 = arith.addf %70, %73 : vector<1x128xf32>
    %c2_50 = arith.constant 2 : index
    %c0_51 = arith.constant 0 : index
    %75 = vector.load %arg9[%c2_50, %c0_51] : memref<8x128xf32, #tpu.memory_space<vmem>>, vector<1x128xf32>
    tpu.vector_store %arg9[%c2_50, %c0_51], %74 {strides = array<i32>} : memref<8x128xf32, #tpu.memory_space<vmem>>, vector<1x128xf32>,
    %c2_52 = arith.constant 2 : index
    %c0_53 = arith.constant 0 : index
    %76 = vector.load %arg10[%c2_52, %c0_53] : memref<8x128xf32, #tpu.memory_space<vmem>>, vector<1x128xf32>
    %77 = arith.mulf %64, %13 : vector<8x128xf32>
    %cst_54 = arith.constant dense<0.000000e+00> : vector<128xf32>
    %78 = vector.multi_reduction <add>, %77, %cst_54 [0] : vector<8x128xf32> to vector<128xf32>
    %79 = vector.shape_cast %78 : vector<128xf32> to vector<1x128xf32>
    %80 = arith.addf %76, %79 : vector<1x128xf32>
    %c2_55 = arith.constant 2 : index
    %c0_56 = arith.constant 0 : index
    %81 = vector.load %arg10[%c2_55, %c0_56] : memref<8x128xf32, #tpu.memory_space<vmem>>, vector<1x128xf32>
    tpu.vector_store %arg10[%c2_55, %c0_56], %80 {strides = array<i32>} : memref<8x128xf32, #tpu.memory_space<vmem>>, vector<1x128xf32>,
    %c3_i32 = arith.constant 3 : i32
    %82 = vector.broadcast %c3_i32 : i32 to vector<8x128xi32>
    %83 = arith.cmpi eq, %4, %82 : vector<8x128xi32>
    %84 = arith.extui %83 : vector<8x128xi1> to vector<8x128xi32>
    %85 = arith.sitofp %84 : vector<8x128xi32> to vector<8x128xf32>
    %c3 = arith.constant 3 : index
    %c0_57 = arith.constant 0 : index
    %86 = vector.load %arg8[%c3, %c0_57] : memref<8x128xf32, #tpu.memory_space<vmem>>, vector<1x128xf32>
    %cst_58 = arith.constant dense<0.000000e+00> : vector<128xf32>
    %87 = vector.multi_reduction <add>, %85, %cst_58 [0] : vector<8x128xf32> to vector<128xf32>
    %88 = vector.shape_cast %87 : vector<128xf32> to vector<1x128xf32>
    %89 = arith.addf %86, %88 : vector<1x128xf32>
    %c3_59 = arith.constant 3 : index
    %c0_60 = arith.constant 0 : index
    %90 = vector.load %arg8[%c3_59, %c0_60] : memref<8x128xf32, #tpu.memory_space<vmem>>, vector<1x128xf32>
    tpu.vector_store %arg8[%c3_59, %c0_60], %89 {strides = array<i32>} : memref<8x128xf32, #tpu.memory_space<vmem>>, vector<1x128xf32>,
    %c3_61 = arith.constant 3 : index
    %c0_62 = arith.constant 0 : index
    %91 = vector.load %arg9[%c3_61, %c0_62] : memref<8x128xf32, #tpu.memory_space<vmem>>, vector<1x128xf32>
    %92 = arith.mulf %85, %3 : vector<8x128xf32>
    %cst_63 = arith.constant dense<0.000000e+00> : vector<128xf32>
    %93 = vector.multi_reduction <add>, %92, %cst_63 [0] : vector<8x128xf32> to vector<128xf32>
    %94 = vector.shape_cast %93 : vector<128xf32> to vector<1x128xf32>
    %95 = arith.addf %91, %94 : vector<1x128xf32>
    %c3_64 = arith.constant 3 : index
    %c0_65 = arith.constant 0 : index
    %96 = vector.load %arg9[%c3_64, %c0_65] : memref<8x128xf32, #tpu.memory_space<vmem>>, vector<1x128xf32>
    tpu.vector_store %arg9[%c3_64, %c0_65], %95 {strides = array<i32>} : memref<8x128xf32, #tpu.memory_space<vmem>>, vector<1x128xf32>,
    %c3_66 = arith.constant 3 : index
    %c0_67 = arith.constant 0 : index
    %97 = vector.load %arg10[%c3_66, %c0_67] : memref<8x128xf32, #tpu.memory_space<vmem>>, vector<1x128xf32>
    %98 = arith.mulf %85, %13 : vector<8x128xf32>
    %cst_68 = arith.constant dense<0.000000e+00> : vector<128xf32>
    %99 = vector.multi_reduction <add>, %98, %cst_68 [0] : vector<8x128xf32> to vector<128xf32>
    %100 = vector.shape_cast %99 : vector<128xf32> to vector<1x128xf32>
    %101 = arith.addf %97, %100 : vector<1x128xf32>
    %c3_69 = arith.constant 3 : index
    %c0_70 = arith.constant 0 : index
    %102 = vector.load %arg10[%c3_69, %c0_70] : memref<8x128xf32, #tpu.memory_space<vmem>>, vector<1x128xf32>
    tpu.vector_store %arg10[%c3_69, %c0_70], %101 {strides = array<i32>} : memref<8x128xf32, #tpu.memory_space<vmem>>, vector<1x128xf32>,
    %c4_i32 = arith.constant 4 : i32
    %103 = vector.broadcast %c4_i32 : i32 to vector<8x128xi32>
    %104 = arith.cmpi eq, %4, %103 : vector<8x128xi32>
    %105 = arith.extui %104 : vector<8x128xi1> to vector<8x128xi32>
    %106 = arith.sitofp %105 : vector<8x128xi32> to vector<8x128xf32>
    %c4 = arith.constant 4 : index
    %c0_71 = arith.constant 0 : index
    %107 = vector.load %arg8[%c4, %c0_71] : memref<8x128xf32, #tpu.memory_space<vmem>>, vector<1x128xf32>
    %cst_72 = arith.constant dense<0.000000e+00> : vector<128xf32>
    %108 = vector.multi_reduction <add>, %106, %cst_72 [0] : vector<8x128xf32> to vector<128xf32>
    %109 = vector.shape_cast %108 : vector<128xf32> to vector<1x128xf32>
    %110 = arith.addf %107, %109 : vector<1x128xf32>
    %c4_73 = arith.constant 4 : index
    %c0_74 = arith.constant 0 : index
    %111 = vector.load %arg8[%c4_73, %c0_74] : memref<8x128xf32, #tpu.memory_space<vmem>>, vector<1x128xf32>
    tpu.vector_store %arg8[%c4_73, %c0_74], %110 {strides = array<i32>} : memref<8x128xf32, #tpu.memory_space<vmem>>, vector<1x128xf32>,
    %c4_75 = arith.constant 4 : index
    %c0_76 = arith.constant 0 : index
    %112 = vector.load %arg9[%c4_75, %c0_76] : memref<8x128xf32, #tpu.memory_space<vmem>>, vector<1x128xf32>
    %113 = arith.mulf %106, %3 : vector<8x128xf32>
    %cst_77 = arith.constant dense<0.000000e+00> : vector<128xf32>
    %114 = vector.multi_reduction <add>, %113, %cst_77 [0] : vector<8x128xf32> to vector<128xf32>
    %115 = vector.shape_cast %114 : vector<128xf32> to vector<1x128xf32>
    %116 = arith.addf %112, %115 : vector<1x128xf32>
    %c4_78 = arith.constant 4 : index
    %c0_79 = arith.constant 0 : index
    %117 = vector.load %arg9[%c4_78, %c0_79] : memref<8x128xf32, #tpu.memory_space<vmem>>, vector<1x128xf32>
    tpu.vector_store %arg9[%c4_78, %c0_79], %116 {strides = array<i32>} : memref<8x128xf32, #tpu.memory_space<vmem>>, vector<1x128xf32>,
    %c4_80 = arith.constant 4 : index
    %c0_81 = arith.constant 0 : index
    %118 = vector.load %arg10[%c4_80, %c0_81] : memref<8x128xf32, #tpu.memory_space<vmem>>, vector<1x128xf32>
    %119 = arith.mulf %106, %13 : vector<8x128xf32>
    %cst_82 = arith.constant dense<0.000000e+00> : vector<128xf32>
    %120 = vector.multi_reduction <add>, %119, %cst_82 [0] : vector<8x128xf32> to vector<128xf32>
    %121 = vector.shape_cast %120 : vector<128xf32> to vector<1x128xf32>
    %122 = arith.addf %118, %121 : vector<1x128xf32>
    %c4_83 = arith.constant 4 : index
    %c0_84 = arith.constant 0 : index
    %123 = vector.load %arg10[%c4_83, %c0_84] : memref<8x128xf32, #tpu.memory_space<vmem>>, vector<1x128xf32>
    tpu.vector_store %arg10[%c4_83, %c0_84], %122 {strides = array<i32>} : memref<8x128xf32, #tpu.memory_space<vmem>>, vector<1x128xf32>,
    %c5_i32 = arith.constant 5 : i32
    %124 = vector.broadcast %c5_i32 : i32 to vector<8x128xi32>
    %125 = arith.cmpi eq, %4, %124 : vector<8x128xi32>
    %126 = arith.extui %125 : vector<8x128xi1> to vector<8x128xi32>
    %127 = arith.sitofp %126 : vector<8x128xi32> to vector<8x128xf32>
    %c5 = arith.constant 5 : index
    %c0_85 = arith.constant 0 : index
    %128 = vector.load %arg8[%c5, %c0_85] : memref<8x128xf32, #tpu.memory_space<vmem>>, vector<1x128xf32>
    %cst_86 = arith.constant dense<0.000000e+00> : vector<128xf32>
    %129 = vector.multi_reduction <add>, %127, %cst_86 [0] : vector<8x128xf32> to vector<128xf32>
    %130 = vector.shape_cast %129 : vector<128xf32> to vector<1x128xf32>
    %131 = arith.addf %128, %130 : vector<1x128xf32>
    %c5_87 = arith.constant 5 : index
    %c0_88 = arith.constant 0 : index
    %132 = vector.load %arg8[%c5_87, %c0_88] : memref<8x128xf32, #tpu.memory_space<vmem>>, vector<1x128xf32>
    tpu.vector_store %arg8[%c5_87, %c0_88], %131 {strides = array<i32>} : memref<8x128xf32, #tpu.memory_space<vmem>>, vector<1x128xf32>,
    %c5_89 = arith.constant 5 : index
    %c0_90 = arith.constant 0 : index
    %133 = vector.load %arg9[%c5_89, %c0_90] : memref<8x128xf32, #tpu.memory_space<vmem>>, vector<1x128xf32>
    %134 = arith.mulf %127, %3 : vector<8x128xf32>
    %cst_91 = arith.constant dense<0.000000e+00> : vector<128xf32>
    %135 = vector.multi_reduction <add>, %134, %cst_91 [0] : vector<8x128xf32> to vector<128xf32>
    %136 = vector.shape_cast %135 : vector<128xf32> to vector<1x128xf32>
    %137 = arith.addf %133, %136 : vector<1x128xf32>
    %c5_92 = arith.constant 5 : index
    %c0_93 = arith.constant 0 : index
    %138 = vector.load %arg9[%c5_92, %c0_93] : memref<8x128xf32, #tpu.memory_space<vmem>>, vector<1x128xf32>
    tpu.vector_store %arg9[%c5_92, %c0_93], %137 {strides = array<i32>} : memref<8x128xf32, #tpu.memory_space<vmem>>, vector<1x128xf32>,
    %c5_94 = arith.constant 5 : index
    %c0_95 = arith.constant 0 : index
    %139 = vector.load %arg10[%c5_94, %c0_95] : memref<8x128xf32, #tpu.memory_space<vmem>>, vector<1x128xf32>
    %140 = arith.mulf %127, %13 : vector<8x128xf32>
    %cst_96 = arith.constant dense<0.000000e+00> : vector<128xf32>
    %141 = vector.multi_reduction <add>, %140, %cst_96 [0] : vector<8x128xf32> to vector<128xf32>
    %142 = vector.shape_cast %141 : vector<128xf32> to vector<1x128xf32>
    %143 = arith.addf %139, %142 : vector<1x128xf32>
    %c5_97 = arith.constant 5 : index
    %c0_98 = arith.constant 0 : index
    %144 = vector.load %arg10[%c5_97, %c0_98] : memref<8x128xf32, #tpu.memory_space<vmem>>, vector<1x128xf32>
    tpu.vector_store %arg10[%c5_97, %c0_98], %143 {strides = array<i32>} : memref<8x128xf32, #tpu.memory_space<vmem>>, vector<1x128xf32>,
    %c6_i32 = arith.constant 6 : i32
    %145 = vector.broadcast %c6_i32 : i32 to vector<8x128xi32>
    %146 = arith.cmpi eq, %4, %145 : vector<8x128xi32>
    %147 = arith.extui %146 : vector<8x128xi1> to vector<8x128xi32>
    %148 = arith.sitofp %147 : vector<8x128xi32> to vector<8x128xf32>
    %c6 = arith.constant 6 : index
    %c0_99 = arith.constant 0 : index
    %149 = vector.load %arg8[%c6, %c0_99] : memref<8x128xf32, #tpu.memory_space<vmem>>, vector<1x128xf32>
    %cst_100 = arith.constant dense<0.000000e+00> : vector<128xf32>
    %150 = vector.multi_reduction <add>, %148, %cst_100 [0] : vector<8x128xf32> to vector<128xf32>
    %151 = vector.shape_cast %150 : vector<128xf32> to vector<1x128xf32>
    %152 = arith.addf %149, %151 : vector<1x128xf32>
    %c6_101 = arith.constant 6 : index
    %c0_102 = arith.constant 0 : index
    %153 = vector.load %arg8[%c6_101, %c0_102] : memref<8x128xf32, #tpu.memory_space<vmem>>, vector<1x128xf32>
    tpu.vector_store %arg8[%c6_101, %c0_102], %152 {strides = array<i32>} : memref<8x128xf32, #tpu.memory_space<vmem>>, vector<1x128xf32>,
    %c6_103 = arith.constant 6 : index
    %c0_104 = arith.constant 0 : index
    %154 = vector.load %arg9[%c6_103, %c0_104] : memref<8x128xf32, #tpu.memory_space<vmem>>, vector<1x128xf32>
    %155 = arith.mulf %148, %3 : vector<8x128xf32>
    %cst_105 = arith.constant dense<0.000000e+00> : vector<128xf32>
    %156 = vector.multi_reduction <add>, %155, %cst_105 [0] : vector<8x128xf32> to vector<128xf32>
    %157 = vector.shape_cast %156 : vector<128xf32> to vector<1x128xf32>
    %158 = arith.addf %154, %157 : vector<1x128xf32>
    %c6_106 = arith.constant 6 : index
    %c0_107 = arith.constant 0 : index
    %159 = vector.load %arg9[%c6_106, %c0_107] : memref<8x128xf32, #tpu.memory_space<vmem>>, vector<1x128xf32>
    tpu.vector_store %arg9[%c6_106, %c0_107], %158 {strides = array<i32>} : memref<8x128xf32, #tpu.memory_space<vmem>>, vector<1x128xf32>,
    %c6_108 = arith.constant 6 : index
    %c0_109 = arith.constant 0 : index
    %160 = vector.load %arg10[%c6_108, %c0_109] : memref<8x128xf32, #tpu.memory_space<vmem>>, vector<1x128xf32>
    %161 = arith.mulf %148, %13 : vector<8x128xf32>
    %cst_110 = arith.constant dense<0.000000e+00> : vector<128xf32>
    %162 = vector.multi_reduction <add>, %161, %cst_110 [0] : vector<8x128xf32> to vector<128xf32>
    %163 = vector.shape_cast %162 : vector<128xf32> to vector<1x128xf32>
    %164 = arith.addf %160, %163 : vector<1x128xf32>
    %c6_111 = arith.constant 6 : index
    %c0_112 = arith.constant 0 : index
    %165 = vector.load %arg10[%c6_111, %c0_112] : memref<8x128xf32, #tpu.memory_space<vmem>>, vector<1x128xf32>
    tpu.vector_store %arg10[%c6_111, %c0_112], %164 {strides = array<i32>} : memref<8x128xf32, #tpu.memory_space<vmem>>, vector<1x128xf32>,
    %c7_i32 = arith.constant 7 : i32
    %166 = vector.broadcast %c7_i32 : i32 to vector<8x128xi32>
    %167 = arith.cmpi eq, %4, %166 : vector<8x128xi32>
    %168 = arith.extui %167 : vector<8x128xi1> to vector<8x128xi32>
    %169 = arith.sitofp %168 : vector<8x128xi32> to vector<8x128xf32>
    %c7 = arith.constant 7 : index
    %c0_113 = arith.constant 0 : index
    %170 = vector.load %arg8[%c7, %c0_113] : memref<8x128xf32, #tpu.memory_space<vmem>>, vector<1x128xf32>
    %cst_114 = arith.constant dense<0.000000e+00> : vector<128xf32>
    %171 = vector.multi_reduction <add>, %169, %cst_114 [0] : vector<8x128xf32> to vector<128xf32>
    %172 = vector.shape_cast %171 : vector<128xf32> to vector<1x128xf32>
    %173 = arith.addf %170, %172 : vector<1x128xf32>
    %c7_115 = arith.constant 7 : index
    %c0_116 = arith.constant 0 : index
    %174 = vector.load %arg8[%c7_115, %c0_116] : memref<8x128xf32, #tpu.memory_space<vmem>>, vector<1x128xf32>
    tpu.vector_store %arg8[%c7_115, %c0_116], %173 {strides = array<i32>} : memref<8x128xf32, #tpu.memory_space<vmem>>, vector<1x128xf32>,
    %c7_117 = arith.constant 7 : index
    %c0_118 = arith.constant 0 : index
    %175 = vector.load %arg9[%c7_117, %c0_118] : memref<8x128xf32, #tpu.memory_space<vmem>>, vector<1x128xf32>
    %176 = arith.mulf %169, %3 : vector<8x128xf32>
    %cst_119 = arith.constant dense<0.000000e+00> : vector<128xf32>
    %177 = vector.multi_reduction <add>, %176, %cst_119 [0] : vector<8x128xf32> to vector<128xf32>
    %178 = vector.shape_cast %177 : vector<128xf32> to vector<1x128xf32>
    %179 = arith.addf %175, %178 : vector<1x128xf32>
    %c7_120 = arith.constant 7 : index
    %c0_121 = arith.constant 0 : index
    %180 = vector.load %arg9[%c7_120, %c0_121] : memref<8x128xf32, #tpu.memory_space<vmem>>, vector<1x128xf32>
    tpu.vector_store %arg9[%c7_120, %c0_121], %179 {strides = array<i32>} : memref<8x128xf32, #tpu.memory_space<vmem>>, vector<1x128xf32>,
    %c7_122 = arith.constant 7 : index
    %c0_123 = arith.constant 0 : index
    %181 = vector.load %arg10[%c7_122, %c0_123] : memref<8x128xf32, #tpu.memory_space<vmem>>, vector<1x128xf32>
    %182 = arith.mulf %169, %13 : vector<8x128xf32>
    %cst_124 = arith.constant dense<0.000000e+00> : vector<128xf32>
    %183 = vector.multi_reduction <add>, %182, %cst_124 [0] : vector<8x128xf32> to vector<128xf32>
    %184 = vector.shape_cast %183 : vector<128xf32> to vector<1x128xf32>
    %185 = arith.addf %181, %184 : vector<1x128xf32>
    %c7_125 = arith.constant 7 : index
    %c0_126 = arith.constant 0 : index
    %186 = vector.load %arg10[%c7_125, %c0_126] : memref<8x128xf32, #tpu.memory_space<vmem>>, vector<1x128xf32>
    tpu.vector_store %arg10[%c7_125, %c0_126], %185 {strides = array<i32>} : memref<8x128xf32, #tpu.memory_space<vmem>>, vector<1x128xf32>,
    %c0_i32_127 = arith.constant 0 : i32
    %187 = arith.cmpi eq, %arg1, %c0_i32_127 : i32
    %188 = arith.extui %187 : i1 to i32
    %c0_i32_128 = arith.constant 0 : i32
    %189 = arith.cmpi ne, %188, %c0_i32_128 : i32
    scf.if %189 {
      %c0_129 = arith.constant 0 : index
      %c0_130 = arith.constant 0 : index
      %190 = vector.load %arg8[%c0_129, %c0_130] : memref<8x128xf32, #tpu.memory_space<vmem>>, vector<8x128xf32>
      %c0_131 = arith.constant 0 : index
      %c0_132 = arith.constant 0 : index
      %c0_133 = arith.constant 0 : index
      %191 = vector.load %arg4[%c0_131, %c0_132, %c0_133] : memref<1x8x128xf32, #tpu.memory_space<vmem>>, vector<1x8x128xf32>
      %192 = vector.shape_cast %191 : vector<1x8x128xf32> to vector<8x128xf32>
      %193 = vector.shape_cast %190 : vector<8x128xf32> to vector<1x8x128xf32>
      tpu.vector_store %arg4[%c0_131, %c0_132, %c0_133], %193 {strides = array<i32>} : memref<1x8x128xf32, #tpu.memory_space<vmem>>, vector<1x8x128xf32>,
      %c0_134 = arith.constant 0 : index
      %c0_135 = arith.constant 0 : index
      %194 = vector.load %arg9[%c0_134, %c0_135] : memref<8x128xf32, #tpu.memory_space<vmem>>, vector<8x128xf32>
      %c0_136 = arith.constant 0 : index
      %c0_137 = arith.constant 0 : index
      %c0_138 = arith.constant 0 : index
      %195 = vector.load %arg5[%c0_136, %c0_137, %c0_138] : memref<1x8x128xf32, #tpu.memory_space<vmem>>, vector<1x8x128xf32>
      %196 = vector.shape_cast %195 : vector<1x8x128xf32> to vector<8x128xf32>
      %197 = vector.shape_cast %194 : vector<8x128xf32> to vector<1x8x128xf32>
      tpu.vector_store %arg5[%c0_136, %c0_137, %c0_138], %197 {strides = array<i32>} : memref<1x8x128xf32, #tpu.memory_space<vmem>>, vector<1x8x128xf32>,
      %c0_139 = arith.constant 0 : index
      %c0_140 = arith.constant 0 : index
      %198 = vector.load %arg10[%c0_139, %c0_140] : memref<8x128xf32, #tpu.memory_space<vmem>>, vector<8x128xf32>
      %c0_141 = arith.constant 0 : index
      %c0_142 = arith.constant 0 : index
      %c0_143 = arith.constant 0 : index
      %199 = vector.load %arg6[%c0_141, %c0_142, %c0_143] : memref<1x8x128xf32, #tpu.memory_space<vmem>>, vector<1x8x128xf32>
      %200 = vector.shape_cast %199 : vector<1x8x128xf32> to vector<8x128xf32>
      %201 = vector.shape_cast %198 : vector<8x128xf32> to vector<1x8x128xf32>
      tpu.vector_store %arg6[%c0_141, %c0_142, %c0_143], %201 {strides = array<i32>} : memref<1x8x128xf32, #tpu.memory_space<vmem>>, vector<1x8x128xf32>,
      %c0_144 = arith.constant 0 : index
      %c0_145 = arith.constant 0 : index
      %202 = vector.load %arg11[%c0_144, %c0_145] : memref<1x128xf32, #tpu.memory_space<vmem>>, vector<1x128xf32>
      %c0_146 = arith.constant 0 : index
      %c0_147 = arith.constant 0 : index
      %c0_148 = arith.constant 0 : index
      %203 = vector.load %arg7[%c0_146, %c0_147, %c0_148] : memref<1x1x128xf32, #tpu.memory_space<vmem>>, vector<1x1x128xf32>
      %204 = vector.shape_cast %203 : vector<1x1x128xf32> to vector<1x128xf32>
      %205 = vector.shape_cast %202 : vector<1x128xf32> to vector<1x1x128xf32>
      tpu.vector_store %arg7[%c0_146, %c0_147, %c0_148], %205 {strides = array<i32>} : memref<1x1x128xf32, #tpu.memory_space<vmem>>, vector<1x1x128xf32>,
    } else {
    }
    return
  }
  func.func @transform_0(%arg0: i32, %arg1: i32) -> (i32, i32) {
    %c1_i32 = arith.constant 1 : i32
    %0 = arith.muli %arg0, %c1_i32 : i32
    %1 = arith.addi %0, %arg1 : i32
    %c0_i32 = arith.constant 0 : i32
    %c0_i32_0 = arith.constant 0 : i32
    return %1, %c0_i32 : i32, i32
  }
  func.func @transform_1(%arg0: i32, %arg1: i32) -> (i32, i32) {
    %c1_i32 = arith.constant 1 : i32
    %0 = arith.muli %arg0, %c1_i32 : i32
    %1 = arith.addi %0, %arg1 : i32
    %c0_i32 = arith.constant 0 : i32
    %c0_i32_0 = arith.constant 0 : i32
    return %1, %c0_i32 : i32, i32
  }
  func.func @transform_2(%arg0: i32, %arg1: i32) -> (i32, i32, i32) {
    %c0_i32 = arith.constant 0 : i32
    %c0_i32_0 = arith.constant 0 : i32
    %c0_i32_1 = arith.constant 0 : i32
    return %arg0, %c0_i32, %c0_i32_0 : i32, i32, i32
  }
  func.func @transform_3(%arg0: i32, %arg1: i32) -> (i32, i32, i32) {
    %c0_i32 = arith.constant 0 : i32
    %c0_i32_0 = arith.constant 0 : i32
    %c0_i32_1 = arith.constant 0 : i32
    return %arg0, %c0_i32, %c0_i32_0 : i32, i32, i32
  }
  func.func @transform_4(%arg0: i32, %arg1: i32) -> (i32, i32, i32) {
    %c0_i32 = arith.constant 0 : i32
    %c0_i32_0 = arith.constant 0 : i32
    %c0_i32_1 = arith.constant 0 : i32
    return %arg0, %c0_i32, %c0_i32_0 : i32, i32, i32
  }
  func.func @transform_5(%arg0: i32, %arg1: i32) -> (i32, i32, i32) {
    %c0_i32 = arith.constant 0 : i32
    %c0_i32_0 = arith.constant 0 : i32
    %c0_i32_1 = arith.constant 0 : i32
    return %arg0, %c0_i32, %c0_i32_0 : i32, i32, i32
  }
}

</mosaic_0001>

<bundles_post_ra>
// kernel: tpu_custom_call.1
= control target key start
LH: loop header
LB: loop body
LE: loop exit
PB: predicated region body
PF: predicated region fallthrough
CT: control target
= control target key end

     0   :  { %s1735_s0 = inlined_call_operand.hbm [shape: f32[16,128], index: 0, kind: input, shape index: {}]   ;;  %s1736_s1 = inlined_call_operand.hbm [shape: s32[16,128], index: 1, kind: input, shape index: {}]   ;;  %s1737_s2 = inlined_call_operand.hbm [shape: f32[2,8,128], index: 2, kind: output, shape index: {0}]   ;;  %s1738_s3 = inlined_call_operand.hbm [shape: f32[2,8,128], index: 3, kind: output, shape index: {1}]   ;;  %s1739_s4 = inlined_call_operand.hbm [shape: f32[2,8,128], index: 4, kind: output, shape index: {2}]   ;;  %s1740_s5 = inlined_call_operand.hbm [shape: f32[2,1,128], index: 5, kind: output, shape index: {3}]  }
   0x1   :  { %1746 = sst [smem:[#allocation22_spill]] %s1735_s0 }
   0x2   :  { %11 = vsyncpa [#allocation7], 0 }
   0x3   :  { %13 = vsyncpa [#allocation7 + $0x1], 0 }
   0x4   :  { %14 = vsyncpa [#allocation10], 0 }
   0x5   :  { %16 = vsyncpa [#allocation10 + $0x1], 0 }
   0x6   :  { %17 = vsyncpa [#allocation8], 0 }
   0x7   :  { %19 = vsyncpa [#allocation8 + $0x1], 0 }
   0x8   :  { %20 = vsyncpa [#allocation13], 0 }
   0x9   :  { %22 = vsyncpa [#allocation13 + $0x1], 0 }
   0xa   :  { %23 = vsyncpa [#allocation16], 0 }
   0xb   :  { %25 = vsyncpa [#allocation16 + $0x1], 0  ;;  %s1287_s18 = smov 0   ;;  %s1289_s19 = smov 0  }
   0xc   :  { %s1291_s20 = smov 0   ;;  %s1293_s21 = smov 0  }
   0xd   :  { %s1295_s22 = smov 0   ;;  %s1297_s23 = smov 0  }
   0xe LB: > { %s1318_s24 = sadd.s32 4294967295, %s1247_s23   ;;  %s1741_s25 = sadd.s32 4294967294, %s1247_s23   ;;  %s1247_s23 = sphi %s1297_s23, %s31_s23   ;;  %s1243_s22 = sphi %s1295_s22, %s1768_s22   ;;  %s1239_s21 = sphi %s1293_s21, %s1767_s21   ;;  %s1235_s20 = sphi %s1291_s20, %s1766_s20   ;;  %s1231_s19 = sphi %s1289_s19, %s1765_s19   ;;  %s1227_s18 = sphi %s1287_s18, %s1764_s18  }
   0xf   : > { %s43_s26 = sadd.s32 1, %s1243_s22  ;;  %s52_s27 = sadd.s32 1, %s1235_s20 }
  0x10   : > { %p45_p0 = scmp.ge.s32.totalorder %s43_s26, 2  ;;  %p59_p1 = scmp.ne.s32.totalorder %s1235_s20, %s1231_s19 }
  0x11   : > { %p60_p2 = scmp.eq.s32.totalorder %s1247_s23, 0  ;;  %p65_p3 = scmp.ne.s32.totalorder %s1231_s19, %s1227_s18 }
  0x12   : > { %s1770_s26 = smov (%p45_p0, %s43_s26), 0  ;;  %p66_p5 = scmp.eq.s32.totalorder %s1318_s24, 0 }
  0x13   : > { %p1330_p4 = por %p60_p2, %p59_p1  ;;  %s49_s29 = ssub.s32 %s1243_s22, %s1770_s26 }
  0x14   : > { %p117_p6 = scmp.eq.s32.totalorder %s1318_s24, 1  ;;  %p50_p7 = scmp.eq.s32.totalorder %s49_s29, 0 }
  0x15   : > { %p1338_p8 = por %p66_p5, %p65_p3  ;;  %p123_p10 = scmp.eq.s32.totalorder %s1741_s25, 1 }
  0x16   : > { %p1342_p9 = por %p117_p6, %p59_p1  ;;  %p953_p13 = scmp.lt.s32.totalorder %s1247_s23, 2 }
  0x17   : > { %s1748_s30 = scalar_select %p1338_p8, 1, 0 }
  0x18   : > { %s1749_s6 = scalar_select %p1342_p9, 1, 0 }
  0x19   : > { %s1349_s7 = scalar_select %p50_p7, %s1235_s20, %s52_s27  }
  0x1a   : > { %p1351_p11 = por %p123_p10, %p65_p3  ;;  %s1358_s9 = sand.u32 1, %s1235_s20  }
  0x1b   : > { %s1742_s10 = sshll.u32 %s1358_s9, 3  ;;  %s895_s11 = sshll.u32 %s1243_s22, 7 }
  0x1c   : > { %s1750_s8 = scalar_select %p1351_p11, 1, 0 }
  0x1d   : > { %s1751_s0 = sld [smem:[#allocation22_spill]]  ;;  %s225_s15 = scalar_lea.vmem [#allocation6], %s1742_s10 }
  0x1e   : > { %s233_s16 = sshll.u32 %s225_s15, 4  ;;  %p1375_p0 = pnand %p953_p13, %p1330_p4  ;;  %s1371_s16 = int_to_ptr.vmem [resolvable:$true] %s233_s16 }
  0x1f   : > { %s222_s27 = scalar_lea.sflag [#allocation7], %s1358_s9 }
  0x20   : > { %p1011_p5 = pneg %p1375_p0 }
  0x23   : > { %s1367_s14 = scalar_lea.hbm %s1751_s0, %s895_s11  ;;  %s1014_s28 = scalar_lea.hbm %s1751_s0, 256 }
  0x24   : > { %s1009_s29 = scalar_lea.hbm %s1367_s14, 128  ;;  %p1015_p4 = scmp.lt.u32.totalorder %s1367_s14, %s1751_s0 }
  0x25   : > { %p1010_p3 = scmp.ne.s32.totalorder %s1367_s14, %s1009_s29  ;;  %p1016_p10 = scmp.lt.u32.totalorder %s1014_s28, %s1009_s29 }
  0x26   : > { %p1018_p12 = scmp.lt.u32.totalorder %s1009_s29, %s1367_s14 }
  0x27   : > { %p1012_p6 = pnand %p1011_p5, %p1010_p3  ;;  %p1017_p13 = por %p1016_p10, %p1015_p4 }
  0x29   : > { %p1013_p7 = pneg %p1012_p6  ;;  %p1019_p1 = por %p1018_p12, %p1017_p13 }
  0x2b   : > { %p1020_p2 = pnand %p1019_p1, %p1013_p7 }
  0x2d   : > { %1023 = shalt.err (!%p1020_p2)
}
  0x2e   : > { %s1024_s10 = scalar_lea.vmem %s1371_s16, 128  ;;  %s1249_s12 = smov [#allocation6]  }
  0x2f   : > { %p1025_p3 = scmp.ne.s32.totalorder %s1371_s16, %s1024_s10  ;;  %s1029_s13 = sshll.u32 %s1249_s12, 4  ;;  %s1030_s13 = int_to_ptr.vmem [resolvable:$false] %s1029_s13 }
  0x30   : > { %s1031_s25 = scalar_lea.vmem %s1030_s13, 256  ;;  %p1032_p9 = scmp.lt.s32.totalorder %s1371_s16, %s1030_s13 }
  0x31   : > { %p1027_p6 = pnand %p1025_p3, %p1011_p5  ;;  %p1033_p4 = scmp.lt.s32.totalorder %s1031_s25, %s1024_s10 }
  0x33   : > { %p1028_p11 = pneg %p1027_p6  ;;  %p1034_p10 = por %p1033_p4, %p1032_p9 }
  0x35   : > { %p1035_p12 = pnand %p1034_p10, %p1028_p11 }
  0x37   : > { %1038 = shalt.err (!%p1035_p12)
}
  0x38   : > { %936 = dma.hbm_to_vmem [thread:$0]  (!%p1375_p0), %s1367_s14, 128, %s1371_s16, %s222_s27  }
  0x39   : > { %p1753_p1 = scmp.lt.s32.totalorder %s1247_s23, 3  ;;  %p1754_p2 = scmp.ge.s32.totalorder %s1247_s23, 1 }
  0x3a   : > { %s1420_s15 = scalar_lea.hbm %s1736_s1, %s895_s11  ;;  %s1756_s12 = sshll.u32 %s1358_s9, 3 }
  0x3b   : > { %p1411_p7 = pnand %p1754_p2, %p1753_p1  ;;  %s244_s13 = scalar_lea.vmem [#allocation9], %s1756_s12 }
  0x3c   : > { %s252_s25 = sshll.u32 %s244_s13, 4  ;;  %s241_s14 = scalar_lea.sflag [#allocation10], %s1358_s9  ;;  %s253_s25 = int_to_ptr.vmem [resolvable:$true] %s252_s25 }
  0x3d   : > { %s1755_s29 = scalar_select %p1411_p7, 1, 0 }
  0x3e   : > { %s1039_s16 = scalar_lea.hbm %s1420_s15, 128  ;;  %s1044_s11 = scalar_lea.hbm %s1736_s1, 256 }
  0x3f   : > { %p1040_p9 = scmp.ne.s32.totalorder %s1420_s15, %s1039_s16  ;;  %p1045_p3 = scmp.lt.u32.totalorder %s1420_s15, %s1736_s1 }
  0x40   : > { %p1046_p6 = scmp.lt.u32.totalorder %s1044_s11, %s1039_s16  ;;  %p1048_p10 = scmp.lt.u32.totalorder %s1039_s16, %s1420_s15 }
  0x41   : > { %p1042_p11 = pnand %p1040_p9, %p1011_p5 }
  0x42   : > { %p1047_p4 = por %p1046_p6, %p1045_p3 }
  0x43   : > { %p1043_p13 = pneg %p1042_p11 }
  0x44   : > { %p1049_p12 = por %p1048_p10, %p1047_p4 }
  0x46   : > { %p1050_p1 = pnand %p1049_p12, %p1043_p13 }
  0x48   : > { %1053 = shalt.err (!%p1050_p1)
}
  0x49   : > { %s1054_s9 = scalar_lea.vmem %s253_s25, 128  ;;  %s1250_s12 = smov [#allocation9]  }
  0x4a   : > { %p1055_p2 = scmp.ne.s32.totalorder %s253_s25, %s1054_s9  ;;  %s1059_s0 = sshll.u32 %s1250_s12, 4  ;;  %s1060_s0 = int_to_ptr.vmem [resolvable:$false] %s1059_s0 }
  0x4b   : > { %s1061_s13 = scalar_lea.vmem %s1060_s0, 256  ;;  %p1062_p8 = scmp.lt.s32.totalorder %s253_s25, %s1060_s0 }
  0x4c   : > { %p1057_p9 = pnand %p1055_p2, %p1011_p5  ;;  %p1063_p7 = scmp.lt.s32.totalorder %s1061_s13, %s1054_s9 }
  0x4e   : > { %p1058_p11 = pneg %p1057_p9  ;;  %p1064_p3 = por %p1063_p7, %p1062_p8 }
  0x50   : > { %p1065_p6 = pnand %p1064_p3, %p1058_p11 }
  0x52   : > { %1068 = shalt.err (!%p1065_p6)
}
  0x53   : > { %939 = dma.hbm_to_vmem [thread:$0]  (!%p1375_p0), %s1420_s15, 128, %s253_s25, %s241_s14  }
  0x54   : > { %p1757_p13 = scmp.ne.s32.totalorder %s1755_s29, 0 }
  0x55   : > { %s1447_s16 = sand.u32 (!%p1757_p13), 1, %s1231_s19   ;;  %p1758_p8 = scmp.ne.s32.totalorder (!%p1757_p13), %s1748_s30, 0 }
  0x56   : > { %261 = sbr.rel (%p1757_p13) target bundleno = 229 (0xe5), region = 28  ;;  %s1450_s27 = sshll.u32 (!%p1757_p13), %s1447_s16, 3 }
  0x57   : > { %s264_s11 = scalar_lea.sflag (!%p1757_p13), [#allocation7], %s1447_s16  ;;  %s267_s10 = scalar_lea.vmem (!%p1757_p13), [#allocation6], %s1450_s27 }
  0x5d   : > { %1206 = dma.done.wait (%p1758_p8), %s264_s11, 128  }
  0x5e   : > { %1208 = vsyncadd (%p1758_p8), %s264_s11, 4294967168  ;;  %s273_s17 = scalar_lea.sflag [#allocation10], %s1447_s16  ;;  %s276_s29 = scalar_lea.vmem [#allocation9], %s1450_s27 }
  0x5f   : > { %1210 = dma.done.wait (%p1758_p8), %s273_s17, 128  }
  0x60   : > { %1212 = vsyncadd (%p1758_p8), %s273_s17, 4294967168  ;;  %v346_v0 = vlaneseq  ;;  %v1251_v1 = vmov -1e+30   ;;  %v1252_v2 = vmov 0.0   ;;  %v1468_v4 = vld [vmem:[%s267_s10] sm:$0xff]  ;;  %v1470_v5 = vld [vmem:[%s276_s29] sm:$0xff] }
  0x61   : > { %331 = vst [vmem:[#allocation5] sm:$0x1] %v1251_v1  ;;  %328 = vst [vmem:[#allocation2] sm:$0xff] %v1252_v2  ;;  %v335_v6 = vrot.slane %v1468_v4, 4  ;;  %vm364_vm0 = vcmp.eq.s32.totalorder %v1470_v5, 0  ;;  %vm396_vm1 = vcmp.eq.s32.totalorder %v1470_v5, 1 }
  0x62   : > { %329 = vst [vmem:[#allocation3] sm:$0xff] %v1252_v2  ;;  %v1466_v3 = vshrl.u32 %v346_v0, 7  ;;  %v1476_v8 = vsel %vm364_vm0, 1.0, %v1252_v2  ;;  %vm428_vm2 = vcmp.eq.s32.totalorder %v1470_v5, 2  ;;  %vm460_vm3 = vcmp.eq.s32.totalorder %v1470_v5, 3  ;;  %s321_s30 = scalar_lea.vmem [#allocation15], %s1447_s16 }
  0x63   : > { %v336_v9 = vmax.f32 %v1468_v4, %v335_v6  ;;  %v377_v10 = vmul.f32 %v1476_v8, %v1468_v4  ;;  %v1485_v11 = vsel %vm396_vm1, 1.0, %v1252_v2  ;;  %v1488_v12 = vsel %vm428_vm2, 1.0, %v1252_v2  ;;  %s698_s15 = sshll.u32 %s321_s30, 4  ;;  %s918_s25 = sshll.u32 %s1239_s21, 4  ;;  %s1524_s15 = int_to_ptr.vmem [resolvable:$true] %s698_s15 }
  0x64   : > { %v348_v7 = vsub.s32 0, %v1466_v3  ;;  %v409_v13 = vmul.f32 %v1485_v11, %v1468_v4  ;;  %v441_v14 = vmul.f32 %v1488_v12, %v1468_v4  ;;  %v1495_v15 = vsel %vm460_vm3, 1.0, %v1252_v2  ;;  %s1535_s9 = scalar_lea.hbm %s1740_s5, %s918_s25  ;;  %s647_s12 = scalar_lea.sflag [#allocation16], %s1447_s16 }
  0x65   : > { %vm492_vm4 = vcmp.eq.s32.totalorder %v1470_v5, 4  ;;  %v337_v16 = vrot.slane %v336_v9, 2  ;;  %v378_v17 = vrot.slane %v377_v10, 4  ;;  %v473_v18 = vmul.f32 %v1495_v15, %v1468_v4  ;;  %s1069_s0 = scalar_lea.vmem %s1524_s15, 16  ;;  %p1759_p5 = scmp.ne.s32.totalorder %s1749_s6, 0 }
  0x66   : > { %v1501_v19 = vsel %vm492_vm4, 1.0, %v1252_v2  ;;  %v410_v20 = vrot.slane %v409_v13, 4  ;;  %v442_v21 = vrot.slane %v441_v14, 4  ;;  %vm524_vm5 = vcmp.eq.s32.totalorder %v1470_v5, 5  ;;  %p1070_p0 = scmp.ne.s32.totalorder %s1524_s15, %s1069_s0  ;;  %s1253_s13 = smov [#allocation15]  }
  0x67   : > { %v505_v22 = vmul.f32 %v1501_v19, %v1468_v4  ;;  %v338_v23 = vmax.f32 %v336_v9, %v337_v16  ;;  %v379_v24 = vadd.f32 %v378_v17, %v377_v10  ;;  %v474_v25 = vrot.slane %v473_v18, 4  ;;  %s1073_s11 = sshll.u32 %s1253_s13, 4  ;;  %s1074_s11 = int_to_ptr.vmem [resolvable:$false] %s1073_s11 }
  0x68   : > { %v1507_v26 = vsel %vm524_vm5, 1.0, %v1252_v2  ;;  %v411_v27 = vadd.f32 %v410_v20, %v409_v13  ;;  %v443_v28 = vadd.f32 %v442_v21, %v441_v14  ;;  %vm556_vm6 = vcmp.eq.s32.totalorder %v1470_v5, 6  ;;  %v334_v34 = vld [vmem:[#allocation5] sm:$0x1]  ;;  %p1071_p7 = pnand %p1070_p0, %p1759_p5  ;;  %s1075_s10 = scalar_lea.vmem %s1074_s11, 32 }
  0x69   : > { %v506_v29 = vrot.slane %v505_v22, 4  ;;  %v537_v30 = vmul.f32 %v1507_v26, %v1468_v4  ;;  %v339_v31 = vrot.slane %v338_v23, 1  ;;  %v380_v32 = vrot.slane %v379_v24, 2  ;;  %v376_v51 = vld [vmem:[#allocation3] sm:$0x1]  ;;  %p1076_p10 = scmp.lt.s32.totalorder %s1524_s15, %s1074_s11  ;;  %p1077_p12 = scmp.lt.s32.totalorder %s1075_s10, %s1069_s0 }
  0x6a   : > { %v475_v33 = vadd.f32 %v474_v25, %v473_v18  ;;  %v412_v35 = vrot.slane %v411_v27, 2  ;;  %v444_v36 = vrot.slane %v443_v28, 2  ;;  %v1513_v42 = vsel %vm556_vm6, 1.0, %v1252_v2  ;;  %v408_v59 = vld [vmem:[#allocation3 + $0x1] sm:$0x1]  ;;  %p1072_p4 = pneg %p1071_p7 }
  0x6b   : > { %v507_v37 = vadd.f32 %v506_v29, %v505_v22  ;;  %v538_v38 = vrot.slane %v537_v30, 4  ;;  %v340_v39 = vmax.f32 %v338_v23, %v339_v31  ;;  %v381_v40 = vadd.f32 %v380_v32, %v379_v24  ;;  %v440_v60 = vld [vmem:[#allocation3 + $0x2] sm:$0x1]  ;;  %v472_v0 = vld [vmem:[#allocation3 + $0x3] sm:$0x1]  ;;  %p1078_p1 = por %p1077_p12, %p1076_p10 }
  0x6c   : > { %v476_v41 = vrot.slane %v475_v33, 2  ;;  %v413_v43 = vadd.f32 %v412_v35, %v411_v27  ;;  %v445_v44 = vadd.f32 %v444_v36, %v443_v28  ;;  %v569_v50 = vmul.f32 %v1513_v42, %v1468_v4  ;;  %v504_v16 = vld [vmem:[#allocation3 + $0x4] sm:$0x1]  ;;  %v536_v24 = vld [vmem:[#allocation3 + $0x5] sm:$0x1] }
  0x6d   : > { %v508_v45 = vrot.slane %v507_v37, 2  ;;  %v539_v46 = vadd.f32 %v538_v38, %v537_v30  ;;  %v341_v47 = vmax.f32 %v334_v34, %v340_v39  ;;  %v382_v48 = vrot.slane %v381_v40, 1  ;;  %p1079_p2 = pnand %p1078_p1, %p1072_p4 }
  0x6e   : > { %v477_v49 = vadd.f32 %v476_v41, %v475_v33  ;;  %v414_v52 = vrot.slane %v413_v43, 1  ;;  %v446_v53 = vrot.slane %v445_v44, 1  ;;  %v570_v25 = vrot.slane %v569_v50, 4 }
  0x6f   : > { %v509_v54 = vadd.f32 %v508_v45, %v507_v37  ;;  %v540_v55 = vrot.slane %v539_v46, 2  ;;  %v342_v56 = vsub.f32 %v334_v34, %v341_v47  ;;  %354 = vst [vmem:[#allocation5] sm:$0x1] %v341_v47  ;;  %v349_v57 = vrot.slane %v341_v47, %v348_v7 }
  0x70   : > { %v383_v58 = vadd.f32 %v382_v48, %v381_v40  ;;  %v478_v61 = vrot.slane %v477_v49, 1  ;;  %v415_v62 = vadd.f32 %v414_v52, %v413_v43  ;;  %v447_v63 = vadd.f32 %v446_v53, %v445_v44 }
  0x71   : > { %v510_v1 = vrot.slane %v509_v54, 1  ;;  %v541_v6 = vadd.f32 %v540_v55, %v539_v46  ;;  %v343_v9 = vmul.f32 1.442695, %v342_v56  ;;  %v351_v10 = vsub.f32 %v1468_v4, %v349_v57 }
  0x72   : > { %v384_v13 = vadd.f32 %v383_v58, %v376_v51  ;;  %v479_v14 = vadd.f32 %v478_v61, %v477_v49  ;;  %v416_v17 = vadd.f32 %v415_v62, %v408_v59  ;;  %v448_v18 = vadd.f32 %v447_v63, %v440_v60 }
  0x73   : > { %v511_v20 = vadd.f32 %v510_v1, %v509_v54  ;;  %v542_v21 = vrot.slane %v541_v6, 1  ;;  %1005 = vpow2.f32 %v343_v9  ;;  %v352_v22 = vmul.f32 1.442695, %v351_v10 }
  0x74   : > { %385 = vst [vmem:[#allocation3] sm:$0x1] %v384_v13  ;;  %v480_v23 = vadd.f32 %v479_v14, %v472_v0  ;;  %417 = vst [vmem:[#allocation3 + $0x1] sm:$0x1] %v416_v17  ;;  %vm588_vm7 = vcmp.eq.s32.totalorder %v1470_v5, 7  ;;  %v368_v29 = vrot.slane %v1476_v8, 4  ;;  %v571_v30 = vadd.f32 %v570_v25, %v569_v50 }
  0x75   : > { %449 = vst [vmem:[#allocation3 + $0x2] sm:$0x1] %v448_v18  ;;  %v512_v27 = vadd.f32 %v511_v20, %v504_v16  ;;  %v543_v28 = vadd.f32 %v542_v21, %v541_v6  ;;  %1007 = vpow2.f32 %v352_v22  ;;  %v1529_v31 = vsel %vm588_vm7, 1.0, %v1252_v2 }
  0x76   : > { %481 = vst [vmem:[#allocation3 + $0x3] sm:$0x1] %v480_v23  ;;  %v400_v32 = vrot.slane %v1485_v11, 4  ;;  %v629_v33 = vld [vmem:[#allocation5] sm:$0x1]  ;;  %v601_v34 = vmul.f32 %v1529_v31, %v1468_v4  ;;  %v369_v2 = vadd.f32 %v1476_v8, %v368_v29  ;;  %v432_v35 = vrot.slane %v1488_v12, 4 }
  0x77   : > { %513 = vst [vmem:[#allocation3 + $0x4] sm:$0x1] %v512_v27  ;;  %v544_v5 = vadd.f32 %v543_v28, %v536_v24  ;;  %630 = vst [vmem:[%s321_s30] sm:$0x1] %v629_v33  ;;  %v572_v36 = vrot.slane %v571_v30, 2  ;;  %v464_v38 = vrot.slane %v1495_v15, 4  ;;  %v496_v39 = vrot.slane %v1501_v19, 4 }
  0x78   : > { %v401_v37 = vadd.f32 %v1485_v11, %v400_v32  ;;  %v602_v40 = vrot.slane %v601_v34, 4  ;;  %v370_v41 = vrot.slane %v369_v2, 2  ;;  %v433_v4 = vadd.f32 %v1488_v12, %v432_v35 }
  0x79   : > { %545 = vst [vmem:[#allocation3 + $0x5] sm:$0x1] %v544_v5  ;;  %v528_v43 = vrot.slane %v1507_v26, 4 }
  0x7a   : > { %1082 = shalt.err (!%p1079_p2)
}
  0x7b   : > { %s1083_s17 = scalar_lea.hbm %s1535_s9, 16  ;;  %s1087_s25 = scalar_lea.hbm %s1740_s5, 32 }
  0x7c   : > { %p1084_p9 = scmp.ne.s32.totalorder %s1535_s9, %s1083_s17  ;;  %p1088_p6 = scmp.lt.u32.totalorder %s1535_s9, %s1740_s5 }
  0x7d   : > { %p1089_p13 = scmp.lt.u32.totalorder %s1087_s25, %s1083_s17  ;;  %p1091_p0 = scmp.lt.u32.totalorder %s1083_s17, %s1535_s9 }
  0x7e   : > { %p1085_p11 = pnand %p1084_p9, %p1759_p5 }
  0x7f   : > { %p1090_p8 = por %p1089_p13, %p1088_p6 }
  0x80   : > { %p1086_p3 = pneg %p1085_p11 }
  0x81   : > { %p1092_p7 = por %p1091_p0, %p1090_p8 }
  0x83   : > { %p1093_p4 = pnand %p1092_p7, %p1086_p3 }
  0x85   : > { %1096 = shalt.err (!%p1093_p4)
}
  0x86   : > { %928 = dma.vmem_to_hbm [thread:$0]  (%p1759_p5), %s1524_s15, 16, %s1535_s9, %s647_s12   ;;  %v573_v44 = vadd.f32 %v572_v36, %v571_v30  ;;  %v402_v45 = vrot.slane %v401_v37, 2  ;;  %v465_v46 = vadd.f32 %v1495_v15, %v464_v38  ;;  %v497_v47 = vadd.f32 %v1501_v19, %v496_v39  ;;  %v568_v56 = vld [vmem:[#allocation3 + $0x6] sm:$0x1]  ;;  %v1006_v61 = vpop.eup %1005  ;;  %v367_v63 = vld [vmem:[#allocation2] sm:$0x1] }
  0x87   : > { %v603_v48 = vadd.f32 %v602_v40, %v601_v34  ;;  %v371_v49 = vadd.f32 %v370_v41, %v369_v2  ;;  %v434_v50 = vrot.slane %v433_v4, 2  ;;  %v1573_v51 = vadd.f32 %v1507_v26, %v528_v43  ;;  %v399_v14 = vld [vmem:[#allocation2 + $0x1] sm:$0x1]  ;;  %v1578_v17 = vpop.eup %1007  ;;  %v431_v28 = vld [vmem:[#allocation2 + $0x2] sm:$0x1]  ;;  %s308_s15 = scalar_lea.vmem [#allocation12], %s1450_s27 }
  0x88   : > { %v574_v52 = vrot.slane %v573_v44, 1  ;;  %v403_v53 = vadd.f32 %v402_v45, %v401_v37  ;;  %v466_v54 = vrot.slane %v465_v46, 2  ;;  %v498_v55 = vrot.slane %v497_v47, 2  ;;  %v600_v3 = vld [vmem:[#allocation3 + $0x7] sm:$0x1]  ;;  %s672_s9 = sshll.u32 %s308_s15, 4  ;;  %s1602_s9 = int_to_ptr.vmem [resolvable:$true] %s672_s9 }
  0x89   : > { %v604_v57 = vrot.slane %v603_v48, 2  ;;  %v372_v58 = vrot.slane %v371_v49, 1  ;;  %v435_v59 = vadd.f32 %v434_v50, %v433_v4  ;;  %v530_v60 = vrot.slane %v1573_v51, 2  ;;  %v463_v33 = vld [vmem:[#allocation2 + $0x3] sm:$0x1]  ;;  %s636_s12 = sand.u32 1, %s1318_s24  }
  0x8a   : > { %v575_v62 = vadd.f32 %v574_v52, %v573_v44  ;;  %v404_v0 = vrot.slane %v403_v53, 1  ;;  %v467_v1 = vadd.f32 %v466_v54, %v465_v46  ;;  %v499_v6 = vadd.f32 %v498_v55, %v497_v47  ;;  %v495_v35 = vld [vmem:[#allocation2 + $0x4] sm:$0x1]  ;;  %s1600_s0 = sshll.u32 %s1239_s21, 7  ;;  %s1616_s10 = scalar_lea.sflag [#allocation13], %s636_s12 }
  0x8b   : > { %v360_v9 = vrot.slane %v1006_v61, %v348_v7  ;;  %v605_v10 = vadd.f32 %v604_v57, %v603_v48  ;;  %v373_v13 = vadd.f32 %v372_v58, %v371_v49  ;;  %v436_v16 = vrot.slane %v435_v59, 1  ;;  %s1608_s21 = scalar_lea.hbm %s1738_s3, %s1600_s0  ;;  %s1097_s17 = scalar_lea.vmem %s1602_s9, 128 }
  0x8c   : > { %v576_v18 = vadd.f32 %v575_v62, %v568_v56  ;;  %v405_v20 = vadd.f32 %v404_v0, %v403_v53  ;;  %v468_v21 = vrot.slane %v467_v1, 1  ;;  %v500_v22 = vrot.slane %v499_v6, 1  ;;  %p1098_p10 = scmp.ne.s32.totalorder %s1602_s9, %s1097_s17  ;;  %s1254_s29 = smov [#allocation12]  }
  0x8d   : > { %v362_v23 = vmul.f32 0.0, %v360_v9  ;;  %v606_v24 = vrot.slane %v605_v10, 1  ;;  %v374_v25 = vadd.f32 %v373_v13, %v367_v63  ;;  %v387_v27 = vmul.f32 %v1578_v17, %v1476_v8  ;;  %s1101_s30 = sshll.u32 %s1254_s29, 4  ;;  %s1102_s30 = int_to_ptr.vmem [resolvable:$false] %s1101_s30 }
  0x8e   : > { %577 = vst [vmem:[#allocation3 + $0x6] sm:$0x1] %v576_v18  ;;  %v406_v7 = vadd.f32 %v405_v20, %v399_v14  ;;  %v419_v29 = vmul.f32 %v1578_v17, %v1485_v11  ;;  %v437_v30 = vadd.f32 %v436_v16, %v435_v59  ;;  %v451_v32 = vmul.f32 %v1578_v17, %v1488_v12  ;;  %v527_v59 = vld [vmem:[#allocation2 + $0x5] sm:$0x1]  ;;  %p1099_p12 = pnand %p1098_p10, %p1759_p5  ;;  %s1103_s25 = scalar_lea.vmem %s1102_s30, 256 }
  0x8f   : > { %363 = vst [vmem:[#allocation4] sm:$0xff] %v362_v23  ;;  %v607_v5 = vadd.f32 %v606_v24, %v605_v10  ;;  %375 = vst [vmem:[#allocation2] sm:$0x1] %v374_v25  ;;  %v388_v34 = vrot.slane %v387_v27, 4  ;;  %v469_v2 = vadd.f32 %v468_v21, %v467_v1  ;;  %v483_v8 = vmul.f32 %v1578_v17, %v1495_v15  ;;  %p1104_p2 = scmp.lt.s32.totalorder %s1602_s9, %s1102_s30  ;;  %p1105_p9 = scmp.lt.s32.totalorder %s1103_s25, %s1097_s17 }
  0x90   : > { %407 = vst [vmem:[#allocation2 + $0x1] sm:$0x1] %v406_v7  ;;  %v420_v36 = vrot.slane %v419_v29, 4  ;;  %v438_v37 = vadd.f32 %v437_v30, %v431_v28  ;;  %v452_v38 = vrot.slane %v451_v32, 4  ;;  %v501_v39 = vadd.f32 %v500_v22, %v499_v6  ;;  %p1100_p1 = pneg %p1099_p12 }
  0x91   : > { %v608_v11 = vadd.f32 %v607_v5, %v600_v3  ;;  %v389_v40 = vadd.f32 %v388_v34, %v387_v27  ;;  %v470_v41 = vadd.f32 %v469_v2, %v463_v33  ;;  %v484_v4 = vrot.slane %v483_v8, 4  ;;  %p1106_p11 = por %p1105_p9, %p1104_p2 }
  0x92   : > { %v421_v12 = vadd.f32 %v420_v36, %v419_v29  ;;  %439 = vst [vmem:[#allocation2 + $0x2] sm:$0x1] %v438_v37  ;;  %v453_v43 = vadd.f32 %v452_v38, %v451_v32  ;;  %v502_v44 = vadd.f32 %v501_v39, %v495_v35  ;;  %v515_v45 = vmul.f32 %v1578_v17, %v1501_v19 }
  0x93   : > { %609 = vst [vmem:[#allocation3 + $0x7] sm:$0x1] %v608_v11  ;;  %v390_v15 = vrot.slane %v389_v40, 2  ;;  %471 = vst [vmem:[#allocation2 + $0x3] sm:$0x1] %v470_v41  ;;  %v485_v46 = vadd.f32 %v484_v4, %v483_v8  ;;  %v531_v47 = vadd.f32 %v530_v60, %v1573_v51  ;;  %v547_v48 = vmul.f32 %v1578_v17, %v1507_v26  ;;  %p1107_p3 = pnand %p1106_p11, %p1100_p1 }
  0x94   : > { %v422_v49 = vrot.slane %v421_v12, 2  ;;  %v454_v50 = vrot.slane %v453_v43, 2  ;;  %503 = vst [vmem:[#allocation2 + $0x4] sm:$0x1] %v502_v44  ;;  %v516_v52 = vrot.slane %v515_v45, 4  ;;  %v560_v53 = vrot.slane %v1513_v42, 4 }
  0x95   : > { %v391_v19 = vadd.f32 %v390_v15, %v389_v40  ;;  %v486_v54 = vrot.slane %v485_v46, 2  ;;  %v532_v55 = vrot.slane %v531_v47, 1  ;;  %v548_v56 = vrot.slane %v547_v48, 4 }
  0x96   : > { %v423_v57 = vadd.f32 %v422_v49, %v421_v12  ;;  %v455_v51 = vadd.f32 %v454_v50, %v453_v43  ;;  %v517_v58 = vadd.f32 %v516_v52, %v515_v45  ;;  %v561_v26 = vadd.f32 %v1513_v42, %v560_v53  ;;  %v386_v18 = vld [vmem:[#allocation4] sm:$0x1]  ;;  %v418_v27 = vld [vmem:[#allocation4 + $0x1] sm:$0x1]  ;;  %v450_v28 = vld [vmem:[#allocation4 + $0x2] sm:$0x1] }
  0x97   : > { %v392_v60 = vrot.slane %v391_v19, 1  ;;  %v487_v61 = vadd.f32 %v486_v54, %v485_v46  ;;  %v533_v62 = vadd.f32 %v532_v55, %v531_v47  ;;  %v549_v63 = vadd.f32 %v548_v56, %v547_v48  ;;  %v482_v33 = vld [vmem:[#allocation4 + $0x3] sm:$0x1] }
  0x98   : > { %v424_v0 = vrot.slane %v423_v57, 1  ;;  %v456_v1 = vrot.slane %v455_v51, 1  ;;  %v518_v6 = vrot.slane %v517_v58, 2  ;;  %v562_v9 = vrot.slane %v561_v26, 2 }
  0x99   : > { %v393_v10 = vadd.f32 %v392_v60, %v391_v19  ;;  %v488_v13 = vrot.slane %v487_v61, 1  ;;  %v534_v14 = vadd.f32 %v533_v62, %v527_v59  ;;  %v550_v16 = vrot.slane %v549_v63, 2 }
  0x9a   : > { %v425_v20 = vadd.f32 %v424_v0, %v423_v57  ;;  %v457_v21 = vadd.f32 %v456_v1, %v455_v51  ;;  %v519_v22 = vadd.f32 %v518_v6, %v517_v58  ;;  %v563_v23 = vadd.f32 %v562_v9, %v561_v26  ;;  %v625_v24 = vld [vmem:[#allocation3] sm:$0xff] }
  0x9b   : > { %v394_v25 = vadd.f32 %v393_v10, %v386_v18  ;;  %v489_v3 = vadd.f32 %v488_v13, %v487_v61  ;;  %535 = vst [vmem:[#allocation2 + $0x5] sm:$0x1] %v534_v14  ;;  %v551_v7 = vadd.f32 %v550_v16, %v549_v63  ;;  %v579_v29 = vmul.f32 %v1578_v17, %v1513_v42 }
  0x9c   : > { %626 = vst [vmem:[%s308_s15] sm:$0xff] %v625_v24  ;;  %v426_v30 = vadd.f32 %v425_v20, %v418_v27  ;;  %v458_v32 = vadd.f32 %v457_v21, %v450_v28  ;;  %v520_v5 = vrot.slane %v519_v22, 1  ;;  %v564_v34 = vrot.slane %v563_v23, 1 }
  0x9d   : > { %1110 = shalt.err (!%p1107_p3)
}
  0x9e   : > { %s1111_s24 = scalar_lea.hbm %s1608_s21, 128  ;;  %s1115_s15 = scalar_lea.hbm %s1738_s3, 256 }
  0x9f   : > { %p1112_p6 = scmp.ne.s32.totalorder %s1608_s21, %s1111_s24  ;;  %p1116_p0 = scmp.lt.u32.totalorder %s1608_s21, %s1738_s3 }
  0xa0   : > { %p1117_p7 = scmp.lt.u32.totalorder %s1115_s15, %s1111_s24  ;;  %p1119_p10 = scmp.lt.u32.totalorder %s1111_s24, %s1608_s21 }
  0xa1   : > { %p1113_p13 = pnand %p1112_p6, %p1759_p5 }
  0xa2   : > { %p1118_p4 = por %p1117_p7, %p1116_p0 }
  0xa3   : > { %p1114_p8 = pneg %p1113_p13 }
  0xa4   : > { %p1120_p12 = por %p1119_p10, %p1118_p4 }
  0xa6   : > { %p1121_p1 = pnand %p1120_p12, %p1114_p8 }
  0xa8   : > { %1124 = shalt.err (!%p1121_p1)
}
  0xa9   : > { %926 = dma.vmem_to_hbm [thread:$0]  (%p1759_p5), %s1602_s9, 128, %s1608_s21, %s1616_s10   ;;  %395 = vst [vmem:[#allocation4] sm:$0x1] %v394_v25  ;;  %v490_v42 = vadd.f32 %v489_v3, %v482_v33  ;;  %v552_v2 = vrot.slane %v551_v7, 1  ;;  %v559_v8 = vld [vmem:[#allocation2 + $0x6] sm:$0x1]  ;;  %v521_v37 = vadd.f32 %v520_v5, %v519_v22  ;;  %v565_v38 = vadd.f32 %v564_v34, %v563_v23 }
  0xaa   : > { %v580_v35 = vrot.slane %v579_v29, 4  ;;  %v592_v36 = vrot.slane %v1529_v31, 4  ;;  %427 = vst [vmem:[#allocation4 + $0x1] sm:$0x1] %v426_v30  ;;  %459 = vst [vmem:[#allocation4 + $0x2] sm:$0x1] %v458_v32  ;;  %v611_v39 = vmul.f32 %v1578_v17, %v1529_v31  ;;  %s1654_s25 = scalar_lea.hbm %s1737_s2, %s1600_s0  ;;  %s1662_s28 = scalar_lea.hbm %s1739_s4, %s1600_s0 }
  0xab   : > { %491 = vst [vmem:[#allocation4 + $0x3] sm:$0x1] %v490_v42  ;;  %v514_v11 = vld [vmem:[#allocation4 + $0x4] sm:$0x1]  ;;  %v553_v40 = vadd.f32 %v552_v2, %v551_v7  ;;  %v546_v43 = vld [vmem:[#allocation4 + $0x5] sm:$0x1]  ;;  %v566_v44 = vadd.f32 %v565_v38, %v559_v8 }
  0xac   : > { %v581_v41 = vadd.f32 %v580_v35, %v579_v29  ;;  %v593_v4 = vadd.f32 %v1529_v31, %v592_v36  ;;  %v522_v12 = vadd.f32 %v521_v37, %v514_v11  ;;  %v612_v45 = vrot.slane %v611_v39, 4  ;;  %v591_v19 = vld [vmem:[#allocation2 + $0x7] sm:$0x1]  ;;  %v578_v56 = vld [vmem:[#allocation4 + $0x6] sm:$0x1]  ;;  %s301_s9 = scalar_lea.vmem [#allocation11], %s1450_s27 }
  0xad   : > { %v554_v15 = vadd.f32 %v553_v40, %v546_v43  ;;  %567 = vst [vmem:[#allocation2 + $0x6] sm:$0x1] %v566_v44  ;;  %v610_v26 = vld [vmem:[#allocation4 + $0x7] sm:$0x1]  ;;  %s659_s11 = sshll.u32 %s301_s9, 4  ;;  %s1745_s21 = scalar_lea.vmem [#allocation14], %s1450_s27  ;;  %s1645_s11 = int_to_ptr.vmem [resolvable:$true] %s659_s11 }
  0xae   : > { %v582_v46 = vrot.slane %v581_v41, 2  ;;  %v594_v47 = vrot.slane %v593_v4, 2  ;;  %523 = vst [vmem:[#allocation4 + $0x4] sm:$0x1] %v522_v12  ;;  %v613_v48 = vadd.f32 %v612_v45, %v611_v39  ;;  %s685_s17 = sshll.u32 %s1745_s21, 4  ;;  %s632_s15 = scalar_lea.sflag [#allocation8], %s1447_s16  ;;  %s1656_s17 = int_to_ptr.vmem [resolvable:$true] %s685_s17 }
  0xaf   : > { %555 = vst [vmem:[#allocation4 + $0x5] sm:$0x1] %v554_v15  ;;  %s1125_s12 = scalar_lea.vmem %s1645_s11, 128  ;;  %s1255_s13 = smov [#allocation11]  }
  0xb0   : > { %v583_v49 = vadd.f32 %v582_v46, %v581_v41  ;;  %v595_v50 = vadd.f32 %v594_v47, %v593_v4  ;;  %v614_v17 = vrot.slane %v613_v48, 2  ;;  %p1126_p2 = scmp.ne.s32.totalorder %s1645_s11, %s1125_s12  ;;  %s1129_s21 = sshll.u32 %s1255_s13, 4  ;;  %s1130_s21 = int_to_ptr.vmem [resolvable:$false] %s1129_s21 }
  0xb1   : > { %s1131_s29 = scalar_lea.vmem %s1130_s21, 256  ;;  %p1132_p3 = scmp.lt.s32.totalorder %s1645_s11, %s1130_s21 }
  0xb2   : > { %v584_v52 = vrot.slane %v583_v49, 1  ;;  %v596_v53 = vrot.slane %v595_v50, 1  ;;  %v615_v54 = vadd.f32 %v614_v17, %v613_v48  ;;  %p1127_p9 = pnand %p1126_p2, %p1759_p5  ;;  %p1133_p6 = scmp.lt.s32.totalorder %s1131_s29, %s1125_s12 }
  0xb4   : > { %v585_v31 = vadd.f32 %v584_v52, %v583_v49  ;;  %v597_v55 = vadd.f32 %v596_v53, %v595_v50  ;;  %v616_v57 = vrot.slane %v615_v54, 1  ;;  %p1128_p11 = pneg %p1127_p9  ;;  %p1134_p13 = por %p1133_p6, %p1132_p3 }
  0xb6   : > { %v586_v51 = vadd.f32 %v585_v31, %v578_v56  ;;  %v598_v58 = vadd.f32 %v597_v55, %v591_v19  ;;  %v617_v59 = vadd.f32 %v616_v57, %v615_v54  ;;  %p1135_p8 = pnand %p1134_p13, %p1128_p11 }
  0xb8   : > { %587 = vst [vmem:[#allocation4 + $0x6] sm:$0x1] %v586_v51  ;;  %599 = vst [vmem:[#allocation2 + $0x7] sm:$0x1] %v598_v58  ;;  %v618_v60 = vadd.f32 %v617_v59, %v610_v26 }
  0xba   : > { %619 = vst [vmem:[#allocation4 + $0x7] sm:$0x1] %v618_v60 }
  0xbf   : > { %v623_v61 = vld [vmem:[#allocation2] sm:$0xff] }
  0xc0   : > { %624 = vst [vmem:[%s301_s9] sm:$0xff] %v623_v61 }
  0xc1   : > { %1138 = shalt.err (!%p1135_p8)
}
  0xc2   : > { %s1139_s16 = scalar_lea.hbm %s1654_s25, 128  ;;  %s1143_s30 = scalar_lea.hbm %s1737_s2, 256 }
  0xc3   : > { %p1140_p0 = scmp.ne.s32.totalorder %s1654_s25, %s1139_s16  ;;  %p1144_p10 = scmp.lt.u32.totalorder %s1654_s25, %s1737_s2 }
  0xc4   : > { %p1145_p12 = scmp.lt.u32.totalorder %s1143_s30, %s1139_s16  ;;  %p1147_p2 = scmp.lt.u32.totalorder %s1139_s16, %s1654_s25 }
  0xc5   : > { %p1141_p7 = pnand %p1140_p0, %p1759_p5 }
  0xc6   : > { %p1146_p1 = por %p1145_p12, %p1144_p10 }
  0xc7   : > { %p1142_p4 = pneg %p1141_p7 }
  0xc8   : > { %p1148_p9 = por %p1147_p2, %p1146_p1 }
  0xca   : > { %p1149_p11 = pnand %p1148_p9, %p1142_p4 }
  0xcc   : > { %1152 = shalt.err (!%p1149_p11)
}
  0xcd   : > { %925 = dma.vmem_to_hbm [thread:$0]  (%p1759_p5), %s1645_s11, 128, %s1654_s25, %s632_s15   ;;  %v627_v62 = vld [vmem:[#allocation4] sm:$0xff] }
  0xce   : > { %s1760_s14 = scalar_lea.vmem [#allocation14], %s1450_s27  ;;  %s1153_s12 = scalar_lea.vmem %s1656_s17, 128 }
  0xcf   : > { %628 = vst [vmem:[%s1760_s14] sm:$0xff] %v627_v62  ;;  %p1154_p3 = scmp.ne.s32.totalorder %s1656_s17, %s1153_s12  ;;  %s1256_s13 = smov [#allocation14]  }
  0xd0   : > { %s1157_s29 = sshll.u32 %s1256_s13, 4  ;;  %s1158_s29 = int_to_ptr.vmem [resolvable:$false] %s1157_s29 }
  0xd1   : > { %p1155_p6 = pnand %p1154_p3, %p1759_p5  ;;  %s1159_s16 = scalar_lea.vmem %s1158_s29, 256 }
  0xd2   : > { %p1160_p8 = scmp.lt.s32.totalorder %s1656_s17, %s1158_s29  ;;  %p1161_p0 = scmp.lt.s32.totalorder %s1159_s16, %s1153_s12 }
  0xd3   : > { %p1156_p13 = pneg %p1155_p6 }
  0xd4   : > { %p1162_p7 = por %p1161_p0, %p1160_p8 }
  0xd6   : > { %p1163_p4 = pnand %p1162_p7, %p1156_p13 }
  0xd8   : > { %1166 = shalt.err (!%p1163_p4)
}
  0xd9   : > { %s1167_s27 = scalar_lea.hbm %s1662_s28, 128  ;;  %s1171_s15 = scalar_lea.hbm %s1739_s4, 256 }
  0xda   : > { %p1168_p10 = scmp.ne.s32.totalorder %s1662_s28, %s1167_s27  ;;  %p1172_p2 = scmp.lt.u32.totalorder %s1662_s28, %s1739_s4 }
  0xdb   : > { %p1173_p9 = scmp.lt.u32.totalorder %s1171_s15, %s1167_s27  ;;  %p1175_p3 = scmp.lt.u32.totalorder %s1167_s27, %s1662_s28 }
  0xdc   : > { %p1169_p12 = pnand %p1168_p10, %p1759_p5 }
  0xdd   : > { %p1174_p11 = por %p1173_p9, %p1172_p2 }
  0xde   : > { %p1170_p1 = pneg %p1169_p12 }
  0xdf   : > { %p1176_p6 = por %p1175_p3, %p1174_p11 }
  0xe1   : > { %p1177_p13 = pnand %p1176_p6, %p1170_p1 }
  0xe3   : > { %1180 = shalt.err (!%p1177_p13)
}
  0xe4   : > { %927 = dma.vmem_to_hbm [thread:$0]  (%p1759_p5), %s1656_s17, 128, %s1662_s28, %s1616_s10  }
  0xe5 PF: > { %s710_s30 = sand.u32 1, %s1227_s18   ;;  %p1761_p8 = scmp.ne.s32.totalorder %s1750_s8, 0 }
  0xe6   : > { %p1762_p0 = scmp.ge.s32.totalorder %s1247_s23, 2  ;;  %s711_s24 = scalar_lea.sflag [#allocation8], %s710_s30 }
  0xe8   : > { %p941_p7 = pnand %p1762_p0, %p1761_p8 }
  0xea   : > { %1214 = dma.done.wait (!%p941_p7), %s711_s24, 128  }
  0xeb   : > { %1216 = vsyncadd (!%p941_p7), %s711_s24, 4294967168  ;;  %s1763_s21 = sadd.s32 4294967294, %s1247_s23  }
  0xec   : > { %s719_s14 = sand.u32 1, %s1763_s21  }
  0xed   : > { %s720_s12 = scalar_lea.sflag [#allocation13], %s719_s14 }
  0xee   : > { %1218 = dma.done.wait (!%p941_p7), %s720_s12, 256  }
  0xef   : > { %1220 = vsyncadd (!%p941_p7), %s720_s12, 4294967040  ;;  %s738_s6 = scalar_lea.sflag [#allocation16], %s710_s30 }
  0xf0   : > { %1222 = dma.done.wait (!%p941_p7), %s738_s6, 16  }
  0xf1   : > { %1224 = vsyncadd (!%p941_p7), %s738_s6, 4294967280  ;;  %s31_s23 = sadd.s32 1, %s1247_s23   ;;  %s1764_s18 = smov %s1231_s19 }
  0xf2   : > { %p28_p5 = scmp.ge.s32.totalorder %s31_s23, 4   ;;  %s1765_s19 = smov %s1235_s20 }
  0xf3   : > { %s1766_s20 = smov %s1349_s7  ;;  %s1767_s21 = smov %s1243_s22 }
  0xf4   : > { %s1768_s22 = smov %s1770_s26  ;;  %30 = sbr.rel (!%p28_p5) target bundleno = 14 (0xe), region = 143 }
  0xfb   :  { %742 = vsyncpa [#allocation7], 1 }
  0xfc   :  { %744 = vsyncpa [#allocation7 + $0x1], 1 }
  0xfd   :  { %745 = vsyncpa [#allocation10], 1 }
  0xfe   :  { %747 = vsyncpa [#allocation10 + $0x1], 1 }
  0xff   :  { %748 = vsyncpa [#allocation8], 1 }
 0x100   :  { %750 = vsyncpa [#allocation8 + $0x1], 1 }
 0x101   :  { %751 = vsyncpa [#allocation13], 1 }
 0x102   :  { %753 = vsyncpa [#allocation13 + $0x1], 1 }
 0x103   :  { %754 = vsyncpa [#allocation16], 1 }
 0x104   :  { %756 = vsyncpa [#allocation16 + $0x1], 1 }

</bundles_post_ra>
